<compile_context>
chip_gen: v6e
topology: v6e:2x2x1
jax: 0.10.0
libtpu: 0.0.40
codegen_flags: <defaults>
</compile_context>

<pallas_src>
import functools

import jax
import jax.numpy as jnp
from jax.experimental import pallas as pl
from jax.experimental.pallas import tpu as pltpu


_GN_EPS = 1e-5   # nn.GroupNorm default


def _pick_tile_n(n_pad):
    for t in (1024, 512, 256, 128):
        if n_pad % t == 0:
            return t
    return n_pad   # unreachable: n_pad is a multiple of 128


def _vmem_limit_bytes(per_step_bytes):
    """Architecture-aware VMEM request: ~2x the per-step footprint, floored at
    16 MiB and capped at 7/8 of physical VMEM (~112 MiB v5e/v6e, ~56 MiB v7x)."""
    try:
        cap = int(pltpu.get_tpu_info().vmem_capacity_bytes)
    except Exception:                       # pragma: no cover - older runtimes
        cap = 64 << 20
    want = 2 * int(per_step_bytes) + (4 << 20)
    return int(min(max(want, 16 << 20), (cap * 7) // 8))


# --------------------------- Pallas kernels ----------------------------------

def _conv1_stats_kernel(x_ref, w1_ref, y1_ref, st_ref, *, K):
    """Pass 1: per-k 1x1 conv (MXU) + per-channel GN1 partial stats.

    x_ref : (K, Cin, TN) bf16      y1_ref: (K, C1, TN) bf16 (raw conv1 output)
    w1_ref: (C1, Cin)    bf16      st_ref: (2, C1, 1)  f32  (sum, sum-of-sq)
    """
    w1 = w1_ref[...]
    c1 = w1.shape[0]
    s = jnp.zeros((c1, 1), jnp.float32)
    ss = jnp.zeros((c1, 1), jnp.float32)
    for k in range(K):                                  # static unroll, K small
        yk = jnp.dot(w1, x_ref[k], preferred_element_type=jnp.float32)  # (C1,TN)
        y1_ref[k] = yk.astype(jnp.bfloat16)
        s = s + jnp.sum(yk, axis=1, keepdims=True)
        ss = ss + jnp.sum(yk * yk, axis=1, keepdims=True)
    st_ref[0] = s
    st_ref[1] = ss


def _conv2_max_kernel(y1_ref, a1_ref, b1_ref, w2_ref, mx_ref, st_ref,
                      *, K, n_valid, need_mask):
    """Pass 2: fused GN1 normalize + ReLU + bf16 cast, conv2, GN2 partial
    stats, running max/min over K.  Never materializes (C2, K*TN).

    y1_ref : (K, C1, TN) bf16     mx_ref: (2, C2, TN) f32 (row0 max_k, row1 min_k)
    a1/b1  : (C1, 1) f32          st_ref: (2, C2, 1)  f32 (sum, sum-of-sq)
    w2_ref : (C2, C1) bf16
    """
    tn = y1_ref.shape[-1]
    w2 = w2_ref[...]
    c2 = w2.shape[0]
    a1 = a1_ref[...]          # per-batch GN1 scale  (gamma * invstd)
    b1 = b1_ref[...]          # per-batch GN1 shift  (beta - mean * scale)

    if need_mask:
        col = jax.lax.broadcasted_iota(jnp.int32, (1, tn), 1)
        valid = (pl.program_id(1) * tn + col) < n_valid          # (1, TN)

    s = jnp.zeros((c2, 1), jnp.float32)
    ss = jnp.zeros((c2, 1), jnp.float32)
    mx = None
    mn = None
    for k in range(K):                                  # static unroll
        # GN1 normalize + ReLU + (pad mask) + bf16 downcast in a single pass.
        z = jnp.maximum(y1_ref[k].astype(jnp.float32) * a1 + b1, 0.0)
        if need_mask:
            z = jnp.where(valid, z, 0.0)                # keep GN2 stats exact
        yk = jnp.dot(w2, z.astype(jnp.bfloat16),
                     preferred_element_type=jnp.float32)          # (C2, TN)
        s = s + jnp.sum(yk, axis=1, keepdims=True)
        ss = ss + jnp.sum(yk * yk, axis=1, keepdims=True)
        # Track max AND min of the *raw* conv2 output: GroupNorm's per-channel
        # scale may be negative, and max_k(a*y+b) = a*max_k(y)+b if a>=0 else
        # a*min_k(y)+b, so the affine can be applied after the reduction.
        mx = yk if mx is None else jnp.maximum(mx, yk)
        mn = yk if mn is None else jnp.minimum(mn, yk)
    mx_ref[0] = mx
    mx_ref[1] = mn
    st_ref[0] = s
    st_ref[1] = ss


# ------------------------------ glue ------------------------------------------

def _gn_affine_from_stats(stats, gamma, beta, num_groups, count):
    """Partial per-channel (sum, sumsq) -> fused per-(batch, channel) GroupNorm
    scale/shift so that y_norm = y * a + b.  Biased variance, eps=1e-5,
    variance clamped to >= 0 (E[x^2]-E[x]^2 can cancel)."""
    B = stats.shape[0]
    C = gamma.shape[0]
    gs = C // num_groups
    per_c = jnp.sum(stats[..., 0], axis=1)                        # (B, 2, C)
    sums = jnp.sum(per_c.reshape(B, 2, num_groups, gs), axis=-1)  # (B, 2, G)
    mean = sums[:, 0] / count
    var = jnp.maximum(sums[:, 1] / count - mean * mean, 0.0)
    inv = jax.lax.rsqrt(var + _GN_EPS)                            # (B, G)
    mean_c = jnp.repeat(mean, gs, axis=1)                         # (B, C)
    inv_c = jnp.repeat(inv, gs, axis=1)
    a = gamma[None, :] * inv_c
    b = beta[None, :] - mean_c * a
    return a, b


def local_feature_fused(x, params, n_valid):
    """LocalFeatureFused: (conv1x1 + GN + ReLU) x2 then max over K.

    x      : (B, K, Cin, N_pad) bfloat16, zero-padded along N (N_pad % 128 == 0)
    params : (w1 (C1,Cin), g1 (C1,), b1 (C1,), w2 (C2,C1), g2 (C2,), b2 (C2,))
    returns: (B, C2, n_valid) float32
    """
    B, K, Cin, N_pad = x.shape
    assert N_pad % 128 == 0, N_pad
    w1, g1, b1, w2, g2, b2 = params
    C1, C2 = w1.shape[0], w2.shape[0]
    # GroupNorm(out // 32, out): channel counts must be multiples of 32.
    assert C1 % 32 == 0 and C2 % 32 == 0, (C1, C2)
    G1, G2 = C1 // 32, C2 // 32

    TN = _pick_tile_n(N_pad)
    NT = N_pad // TN
    count = float(K * n_valid)
    need_mask = (N_pad != n_valid)

    w1 = w1.astype(jnp.bfloat16)
    w2 = w2.astype(jnp.bfloat16)

    # ---- pass 1: conv1 + GN1 partial stats ----------------------------------
    vmem1 = (2 * 2 * K * Cin * TN + 2 * 2 * K * C1 * TN
             + 2 * C1 * Cin + 16 * C1 * TN)
    y1, st1 = pl.pallas_call(
        functools.partial(_conv1_stats_kernel, K=K),
        out_shape=(jax.ShapeDtypeStruct((B, K, C1, N_pad), jnp.bfloat16),
                   jax.ShapeDtypeStruct((B, NT, 2, C1, 1), jnp.float32)),
        grid_spec=pltpu.PrefetchScalarGridSpec(
            num_scalar_prefetch=0,
            grid=(B, NT),
            in_specs=[
                pl.BlockSpec((None, K, Cin, TN), lambda b, n: (b, 0, 0, n)),
                pl.BlockSpec((C1, Cin), lambda b, n: (0, 0)),
            ],
            out_specs=[
                pl.BlockSpec((None, K, C1, TN), lambda b, n: (b, 0, 0, n)),
                pl.BlockSpec((None, None, 2, C1, 1),
                             lambda b, n: (b, n, 0, 0, 0)),
            ]),
        compiler_params=pltpu.CompilerParams(
            dimension_semantics=("parallel", "parallel"),
            vmem_limit_bytes=_vmem_limit_bytes(vmem1)),
    )(x, w1)

    # GN1 stats -> per-(batch, channel) fused scale/shift (tiny XLA glue).
    a1, sh1 = _gn_affine_from_stats(st1, g1, b1, G1, count)
    a1 = a1[:, :, None]                                   # (B, C1, 1)
    sh1 = sh1[:, :, None]

    # ---- pass 2: GN1-norm+ReLU -> conv2 -> GN2 stats + max/min over K -------
    vmem2 = (2 * 2 * K * C1 * TN + 2 * 4 * 2 * C2 * TN
             + 2 * C2 * C1 + 16 * (C1 + C2) * TN)
    mxmn, st2 = pl.pallas_call(
        functools.partial(_conv2_max_kernel, K=K, n_valid=n_valid,
                          need_mask=need_mask),
        out_shape=(jax.ShapeDtypeStruct((B, 2, C2, N_pad), jnp.float32),
                   jax.ShapeDtypeStruct((B, NT, 2, C2, 1), jnp.float32)),
        grid_spec=pltpu.PrefetchScalarGridSpec(
            num_scalar_prefetch=0,
            grid=(B, NT),
            in_specs=[
                pl.BlockSpec((None, K, C1, TN), lambda b, n: (b, 0, 0, n)),
                pl.BlockSpec((None, C1, 1), lambda b, n: (b, 0, 0)),
                pl.BlockSpec((None, C1, 1), lambda b, n: (b, 0, 0)),
                pl.BlockSpec((C2, C1), lambda b, n: (0, 0)),
            ],
            out_specs=[
                pl.BlockSpec((None, 2, C2, TN), lambda b, n: (b, 0, 0, n)),
                pl.BlockSpec((None, None, 2, C2, 1),
                             lambda b, n: (b, n, 0, 0, 0)),
            ]),
        compiler_params=pltpu.CompilerParams(
            dimension_semantics=("parallel", "parallel"),
            vmem_limit_bytes=_vmem_limit_bytes(vmem2)),
    )(y1, a1, sh1, w2)

    # GN2 normalize + final ReLU on the already reduced (C2, N) tensor.
    a2, sh2 = _gn_affine_from_stats(st2, g2, b2, G2, count)
    a2 = a2[:, :, None]
    sh2 = sh2[:, :, None]
    mx, mn = mxmn[:, 0], mxmn[:, 1]
    out = jnp.where(a2 >= 0.0, a2 * mx + sh2, a2 * mn + sh2)
    return jnp.maximum(out, 0.0)[:, :, :n_valid]


def local_feature_forward(feature, xyz, radius, K, params):
    """LocalFeatue.forward (permute=False, use_ppf=False).

    feature: (B, N, C1) f32, xyz: (B, N, 3) f32  ->  (B, C_out2, N) f32
    """
    B, N, C1 = feature.shape

    # ----- sample_and_group with M = -1 (new_xyz = xyz): plain-JAX glue ------
    sq = jnp.sum(xyz * xyz, axis=-1)
    dists = (sq[:, :, None] + sq[:, None, :]
             - 2.0 * jnp.einsum('bnc,bmc->bnm', xyz, xyz))
    # ball_query: K smallest in-radius indices (ascending), sentinel N outside.
    idx = jnp.broadcast_to(jnp.arange(N, dtype=jnp.int32)[None, None, :],
                           (B, N, N))
    idx = jnp.where(dists > radius ** 2, jnp.int32(N), idx)
    neg_topk, _ = jax.lax.top_k(-idx, K)          # K smallest, ascending order
    idx = -neg_topk                               # (B, N, K)
    idx = jnp.where(idx == N, idx[:, :, 0:1], idx)   # self dist 0 => col 0 < N

    # Gather directly into the kernel layout (B, K, C, N): no HBM transpose of
    # the big (B, N, K, 6+C1) tensor.
    xyz_t = jnp.transpose(xyz, (0, 2, 1))         # (B, 3, N)
    feat_t = jnp.transpose(feature, (0, 2, 1))    # (B, C1, N)
    idx_t = jnp.transpose(idx, (0, 2, 1))         # (B, K, N)

    def gather_cf(src, ind):                      # (C, N), (K, N) -> (K, C, N)
        return jnp.take(src, ind, axis=1).transpose(1, 0, 2)

    grouped_xyz = jax.vmap(gather_cf)(xyz_t, idx_t) - xyz_t[:, None]  # (B,K,3,N)
    grouped_feat = jax.vmap(gather_cf)(feat_t, idx_t)                 # (B,K,C1,N)
    xyz_rep = jnp.broadcast_to(xyz_t[:, None], (B, K, 3, N))
    # Channel order matches torch.cat([xyz, grouped_xyz, grouped_points], -1).
    x = jnp.concatenate([xyz_rep, grouped_xyz, grouped_feat], axis=2)  # (B,K,6+C1,N)

    # Pad N to a multiple of 128 (lane-dense tiles, unmasked stores) and feed
    # bf16 (MXU-native) -- halves the HBM->VMEM DMA of the largest slab.
    n_pad = ((N + 127) // 128) * 128
    if n_pad != N:
        x = jnp.pad(x, ((0, 0), (0, 0), (0, 0), (0, n_pad - N)))
    x = x.astype(jnp.bfloat16)

    return local_feature_fused(x, params, N)


if __name__ == "__main__":
    # Small, module-consistent shapes.
    B, N, C1, K = 2, 16, 26, 8
    radius = 0.5
    in_dim = C1 + 6                 # channels after [xyz | grouped_xyz | feat]
    out_dims = (32, 64)             # GroupNorm(out // 32, out) requires >= 32

    key = jax.random.PRNGKey(0)
    kx, kf, kw1, kw2, kg1, kb1, kg2, kb2 = jax.random.split(key, 8)

    xyz = jax.random.uniform(kx, (B, N, 3), dtype=jnp.float32)
    feature = jax.random.normal(kf, (B, N, C1), dtype=jnp.float32)

    # Conv2d 1x1 (no bias) weights as (out, in); GroupNorm affine as (C,).
    w1 = 0.1 * jax.random.normal(kw1, (out_dims[0], in_dim), jnp.float32)
    w2 = 0.1 * jax.random.normal(kw2, (out_dims[1], out_dims[0]), jnp.float32)
    g1 = 1.0 + 0.01 * jax.random.normal(kg1, (out_dims[0],), jnp.float32)
    b1 = 0.01 * jax.random.normal(kb1, (out_dims[0],), jnp.float32)
    g2 = 1.0 + 0.01 * jax.random.normal(kg2, (out_dims[1],), jnp.float32)
    b2 = 0.01 * jax.random.normal(kb2, (out_dims[1],), jnp.float32)
    params = (w1, g1, b1, w2, g2, b2)

    fwd = jax.jit(functools.partial(local_feature_forward, radius=radius, K=K))
    out = fwd(feature, xyz, params=params)
    jax.block_until_ready(out)
    assert out.shape == (B, out_dims[1], N), out.shape
    assert bool(jnp.all(jnp.isfinite(out)))
    print("KERNEL_OK")
</pallas_src>

<mosaic_0001>
module attributes {stable_mosaic.version = 11 : i64} {
  func.func @_conv1_stats_kernel(%arg0: i32, %arg1: i32, %arg2: memref<1x8x32x128xbf16, #tpu.memory_space<vmem>>, %arg3: memref<32x32xbf16, #tpu.memory_space<vmem>>, %arg4: memref<1x8x32x128xbf16, #tpu.memory_space<vmem>>, %arg5: memref<1x1x2x32x1xf32, #tpu.memory_space<vmem>>) attributes {dimension_semantics = [#tpu.dimension_semantics<parallel>, #tpu.dimension_semantics<parallel>], iteration_bounds = array<i64: 2, 1>, scalar_prefetch = 0 : i64, scratch_operands = 0 : i64, tpu.core_type = #tpu.core_type<tc>, window_params = [{transform_indices = @transform_0, window_bounds = array<i64: 1, 8, 32, 128>}, {pipeline_mode = #tpu.pipeline_mode<synchronous>, transform_indices = @transform_1, window_bounds = array<i64: 32, 32>}, {transform_indices = @transform_2, window_bounds = array<i64: 1, 8, 32, 128>}, {transform_indices = @transform_3, window_bounds = array<i64: 1, 1, 2, 32, 1>}]} {
    %c0 = arith.constant 0 : index
    %c0_0 = arith.constant 0 : index
    %0 = vector.load %arg3[%c0, %c0_0] : memref<32x32xbf16, #tpu.memory_space<vmem>>, vector<32x32xbf16>
    %cst = arith.constant 0.000000e+00 : f32
    %1 = vector.broadcast %cst : f32 to vector<32x1xf32>
    %cst_1 = arith.constant 0.000000e+00 : f32
    %2 = vector.broadcast %cst_1 : f32 to vector<32x1xf32>
    %c0_2 = arith.constant 0 : index
    %c0_3 = arith.constant 0 : index
    %c0_4 = arith.constant 0 : index
    %c0_5 = arith.constant 0 : index
    %3 = vector.load %arg2[%c0_2, %c0_3, %c0_4, %c0_5] : memref<1x8x32x128xbf16, #tpu.memory_space<vmem>>, vector<1x1x32x128xbf16>
    %4 = vector.shape_cast %3 : vector<1x1x32x128xbf16> to vector<32x128xbf16>
    %cst_6 = arith.constant dense<0.000000e+00> : vector<32x128xf32>
    %5 = tpu.matmul %0, %4, %cst_6 {dimension_numbers = #tpu.dot_dimension_numbers<[1], [0], [0], [1], [0, 0, 1, 1], [], []>} : vector<32x32xbf16>, vector<32x128xbf16>, vector<32x128xf32> -> vector<32x128xf32>
    %6 = arith.truncf %5 : vector<32x128xf32> to vector<32x128xbf16>
    %c0_7 = arith.constant 0 : index
    %c0_8 = arith.constant 0 : index
    %c0_9 = arith.constant 0 : index
    %c0_10 = arith.constant 0 : index
    %7 = vector.load %arg4[%c0_7, %c0_8, %c0_9, %c0_10] : memref<1x8x32x128xbf16, #tpu.memory_space<vmem>>, vector<1x1x32x128xbf16>
    %8 = vector.shape_cast %7 : vector<1x1x32x128xbf16> to vector<32x128xbf16>
    %9 = vector.shape_cast %6 : vector<32x128xbf16> to vector<1x1x32x128xbf16>
    tpu.vector_store %arg4[%c0_7, %c0_8, %c0_9, %c0_10], %9 {strides = array<i32>} : memref<1x8x32x128xbf16, #tpu.memory_space<vmem>>, vector<1x1x32x128xbf16>,
    %cst_11 = arith.constant dense<0.000000e+00> : vector<32xf32>
    %10 = vector.multi_reduction <add>, %5, %cst_11 [1] : vector<32x128xf32> to vector<32xf32>
    %11 = vector.shape_cast %10 : vector<32xf32> to vector<32x1xf32>
    %12 = arith.addf %1, %11 : vector<32x1xf32>
    %13 = arith.mulf %5, %5 : vector<32x128xf32>
    %cst_12 = arith.constant dense<0.000000e+00> : vector<32xf32>
    %14 = vector.multi_reduction <add>, %13, %cst_12 [1] : vector<32x128xf32> to vector<32xf32>
    %15 = vector.shape_cast %14 : vector<32xf32> to vector<32x1xf32>
    %16 = arith.addf %2, %15 : vector<32x1xf32>
    %c0_13 = arith.constant 0 : index
    %c1 = arith.constant 1 : index
    %c0_14 = arith.constant 0 : index
    %c0_15 = arith.constant 0 : index
    %17 = vector.load %arg2[%c0_13, %c1, %c0_14, %c0_15] : memref<1x8x32x128xbf16, #tpu.memory_space<vmem>>, vector<1x1x32x128xbf16>
    %18 = vector.shape_cast %17 : vector<1x1x32x128xbf16> to vector<32x128xbf16>
    %cst_16 = arith.constant dense<0.000000e+00> : vector<32x128xf32>
    %19 = tpu.matmul %0, %18, %cst_16 {dimension_numbers = #tpu.dot_dimension_numbers<[1], [0], [0], [1], [0, 0, 1, 1], [], []>} : vector<32x32xbf16>, vector<32x128xbf16>, vector<32x128xf32> -> vector<32x128xf32>
    %20 = arith.truncf %19 : vector<32x128xf32> to vector<32x128xbf16>
    %c0_17 = arith.constant 0 : index
    %c1_18 = arith.constant 1 : index
    %c0_19 = arith.constant 0 : index
    %c0_20 = arith.constant 0 : index
    %21 = vector.load %arg4[%c0_17, %c1_18, %c0_19, %c0_20] : memref<1x8x32x128xbf16, #tpu.memory_space<vmem>>, vector<1x1x32x128xbf16>
    %22 = vector.shape_cast %21 : vector<1x1x32x128xbf16> to vector<32x128xbf16>
    %23 = vector.shape_cast %20 : vector<32x128xbf16> to vector<1x1x32x128xbf16>
    tpu.vector_store %arg4[%c0_17, %c1_18, %c0_19, %c0_20], %23 {strides = array<i32>} : memref<1x8x32x128xbf16, #tpu.memory_space<vmem>>, vector<1x1x32x128xbf16>,
    %cst_21 = arith.constant dense<0.000000e+00> : vector<32xf32>
    %24 = vector.multi_reduction <add>, %19, %cst_21 [1] : vector<32x128xf32> to vector<32xf32>
    %25 = vector.shape_cast %24 : vector<32xf32> to vector<32x1xf32>
    %26 = arith.addf %12, %25 : vector<32x1xf32>
    %27 = arith.mulf %19, %19 : vector<32x128xf32>
    %cst_22 = arith.constant dense<0.000000e+00> : vector<32xf32>
    %28 = vector.multi_reduction <add>, %27, %cst_22 [1] : vector<32x128xf32> to vector<32xf32>
    %29 = vector.shape_cast %28 : vector<32xf32> to vector<32x1xf32>
    %30 = arith.addf %16, %29 : vector<32x1xf32>
    %c0_23 = arith.constant 0 : index
    %c2 = arith.constant 2 : index
    %c0_24 = arith.constant 0 : index
    %c0_25 = arith.constant 0 : index
    %31 = vector.load %arg2[%c0_23, %c2, %c0_24, %c0_25] : memref<1x8x32x128xbf16, #tpu.memory_space<vmem>>, vector<1x1x32x128xbf16>
    %32 = vector.shape_cast %31 : vector<1x1x32x128xbf16> to vector<32x128xbf16>
    %cst_26 = arith.constant dense<0.000000e+00> : vector<32x128xf32>
    %33 = tpu.matmul %0, %32, %cst_26 {dimension_numbers = #tpu.dot_dimension_numbers<[1], [0], [0], [1], [0, 0, 1, 1], [], []>} : vector<32x32xbf16>, vector<32x128xbf16>, vector<32x128xf32> -> vector<32x128xf32>
    %34 = arith.truncf %33 : vector<32x128xf32> to vector<32x128xbf16>
    %c0_27 = arith.constant 0 : index
    %c2_28 = arith.constant 2 : index
    %c0_29 = arith.constant 0 : index
    %c0_30 = arith.constant 0 : index
    %35 = vector.load %arg4[%c0_27, %c2_28, %c0_29, %c0_30] : memref<1x8x32x128xbf16, #tpu.memory_space<vmem>>, vector<1x1x32x128xbf16>
    %36 = vector.shape_cast %35 : vector<1x1x32x128xbf16> to vector<32x128xbf16>
    %37 = vector.shape_cast %34 : vector<32x128xbf16> to vector<1x1x32x128xbf16>
    tpu.vector_store %arg4[%c0_27, %c2_28, %c0_29, %c0_30], %37 {strides = array<i32>} : memref<1x8x32x128xbf16, #tpu.memory_space<vmem>>, vector<1x1x32x128xbf16>,
    %cst_31 = arith.constant dense<0.000000e+00> : vector<32xf32>
    %38 = vector.multi_reduction <add>, %33, %cst_31 [1] : vector<32x128xf32> to vector<32xf32>
    %39 = vector.shape_cast %38 : vector<32xf32> to vector<32x1xf32>
    %40 = arith.addf %26, %39 : vector<32x1xf32>
    %41 = arith.mulf %33, %33 : vector<32x128xf32>
    %cst_32 = arith.constant dense<0.000000e+00> : vector<32xf32>
    %42 = vector.multi_reduction <add>, %41, %cst_32 [1] : vector<32x128xf32> to vector<32xf32>
    %43 = vector.shape_cast %42 : vector<32xf32> to vector<32x1xf32>
    %44 = arith.addf %30, %43 : vector<32x1xf32>
    %c0_33 = arith.constant 0 : index
    %c3 = arith.constant 3 : index
    %c0_34 = arith.constant 0 : index
    %c0_35 = arith.constant 0 : index
    %45 = vector.load %arg2[%c0_33, %c3, %c0_34, %c0_35] : memref<1x8x32x128xbf16, #tpu.memory_space<vmem>>, vector<1x1x32x128xbf16>
    %46 = vector.shape_cast %45 : vector<1x1x32x128xbf16> to vector<32x128xbf16>
    %cst_36 = arith.constant dense<0.000000e+00> : vector<32x128xf32>
    %47 = tpu.matmul %0, %46, %cst_36 {dimension_numbers = #tpu.dot_dimension_numbers<[1], [0], [0], [1], [0, 0, 1, 1], [], []>} : vector<32x32xbf16>, vector<32x128xbf16>, vector<32x128xf32> -> vector<32x128xf32>
    %48 = arith.truncf %47 : vector<32x128xf32> to vector<32x128xbf16>
    %c0_37 = arith.constant 0 : index
    %c3_38 = arith.constant 3 : index
    %c0_39 = arith.constant 0 : index
    %c0_40 = arith.constant 0 : index
    %49 = vector.load %arg4[%c0_37, %c3_38, %c0_39, %c0_40] : memref<1x8x32x128xbf16, #tpu.memory_space<vmem>>, vector<1x1x32x128xbf16>
    %50 = vector.shape_cast %49 : vector<1x1x32x128xbf16> to vector<32x128xbf16>
    %51 = vector.shape_cast %48 : vector<32x128xbf16> to vector<1x1x32x128xbf16>
    tpu.vector_store %arg4[%c0_37, %c3_38, %c0_39, %c0_40], %51 {strides = array<i32>} : memref<1x8x32x128xbf16, #tpu.memory_space<vmem>>, vector<1x1x32x128xbf16>,
    %cst_41 = arith.constant dense<0.000000e+00> : vector<32xf32>
    %52 = vector.multi_reduction <add>, %47, %cst_41 [1] : vector<32x128xf32> to vector<32xf32>
    %53 = vector.shape_cast %52 : vector<32xf32> to vector<32x1xf32>
    %54 = arith.addf %40, %53 : vector<32x1xf32>
    %55 = arith.mulf %47, %47 : vector<32x128xf32>
    %cst_42 = arith.constant dense<0.000000e+00> : vector<32xf32>
    %56 = vector.multi_reduction <add>, %55, %cst_42 [1] : vector<32x128xf32> to vector<32xf32>
    %57 = vector.shape_cast %56 : vector<32xf32> to vector<32x1xf32>
    %58 = arith.addf %44, %57 : vector<32x1xf32>
    %c0_43 = arith.constant 0 : index
    %c4 = arith.constant 4 : index
    %c0_44 = arith.constant 0 : index
    %c0_45 = arith.constant 0 : index
    %59 = vector.load %arg2[%c0_43, %c4, %c0_44, %c0_45] : memref<1x8x32x128xbf16, #tpu.memory_space<vmem>>, vector<1x1x32x128xbf16>
    %60 = vector.shape_cast %59 : vector<1x1x32x128xbf16> to vector<32x128xbf16>
    %cst_46 = arith.constant dense<0.000000e+00> : vector<32x128xf32>
    %61 = tpu.matmul %0, %60, %cst_46 {dimension_numbers = #tpu.dot_dimension_numbers<[1], [0], [0], [1], [0, 0, 1, 1], [], []>} : vector<32x32xbf16>, vector<32x128xbf16>, vector<32x128xf32> -> vector<32x128xf32>
    %62 = arith.truncf %61 : vector<32x128xf32> to vector<32x128xbf16>
    %c0_47 = arith.constant 0 : index
    %c4_48 = arith.constant 4 : index
    %c0_49 = arith.constant 0 : index
    %c0_50 = arith.constant 0 : index
    %63 = vector.load %arg4[%c0_47, %c4_48, %c0_49, %c0_50] : memref<1x8x32x128xbf16, #tpu.memory_space<vmem>>, vector<1x1x32x128xbf16>
    %64 = vector.shape_cast %63 : vector<1x1x32x128xbf16> to vector<32x128xbf16>
    %65 = vector.shape_cast %62 : vector<32x128xbf16> to vector<1x1x32x128xbf16>
    tpu.vector_store %arg4[%c0_47, %c4_48, %c0_49, %c0_50], %65 {strides = array<i32>} : memref<1x8x32x128xbf16, #tpu.memory_space<vmem>>, vector<1x1x32x128xbf16>,
    %cst_51 = arith.constant dense<0.000000e+00> : vector<32xf32>
    %66 = vector.multi_reduction <add>, %61, %cst_51 [1] : vector<32x128xf32> to vector<32xf32>
    %67 = vector.shape_cast %66 : vector<32xf32> to vector<32x1xf32>
    %68 = arith.addf %54, %67 : vector<32x1xf32>
    %69 = arith.mulf %61, %61 : vector<32x128xf32>
    %cst_52 = arith.constant dense<0.000000e+00> : vector<32xf32>
    %70 = vector.multi_reduction <add>, %69, %cst_52 [1] : vector<32x128xf32> to vector<32xf32>
    %71 = vector.shape_cast %70 : vector<32xf32> to vector<32x1xf32>
    %72 = arith.addf %58, %71 : vector<32x1xf32>
    %c0_53 = arith.constant 0 : index
    %c5 = arith.constant 5 : index
    %c0_54 = arith.constant 0 : index
    %c0_55 = arith.constant 0 : index
    %73 = vector.load %arg2[%c0_53, %c5, %c0_54, %c0_55] : memref<1x8x32x128xbf16, #tpu.memory_space<vmem>>, vector<1x1x32x128xbf16>
    %74 = vector.shape_cast %73 : vector<1x1x32x128xbf16> to vector<32x128xbf16>
    %cst_56 = arith.constant dense<0.000000e+00> : vector<32x128xf32>
    %75 = tpu.matmul %0, %74, %cst_56 {dimension_numbers = #tpu.dot_dimension_numbers<[1], [0], [0], [1], [0, 0, 1, 1], [], []>} : vector<32x32xbf16>, vector<32x128xbf16>, vector<32x128xf32> -> vector<32x128xf32>
    %76 = arith.truncf %75 : vector<32x128xf32> to vector<32x128xbf16>
    %c0_57 = arith.constant 0 : index
    %c5_58 = arith.constant 5 : index
    %c0_59 = arith.constant 0 : index
    %c0_60 = arith.constant 0 : index
    %77 = vector.load %arg4[%c0_57, %c5_58, %c0_59, %c0_60] : memref<1x8x32x128xbf16, #tpu.memory_space<vmem>>, vector<1x1x32x128xbf16>
    %78 = vector.shape_cast %77 : vector<1x1x32x128xbf16> to vector<32x128xbf16>
    %79 = vector.shape_cast %76 : vector<32x128xbf16> to vector<1x1x32x128xbf16>
    tpu.vector_store %arg4[%c0_57, %c5_58, %c0_59, %c0_60], %79 {strides = array<i32>} : memref<1x8x32x128xbf16, #tpu.memory_space<vmem>>, vector<1x1x32x128xbf16>,
    %cst_61 = arith.constant dense<0.000000e+00> : vector<32xf32>
    %80 = vector.multi_reduction <add>, %75, %cst_61 [1] : vector<32x128xf32> to vector<32xf32>
    %81 = vector.shape_cast %80 : vector<32xf32> to vector<32x1xf32>
    %82 = arith.addf %68, %81 : vector<32x1xf32>
    %83 = arith.mulf %75, %75 : vector<32x128xf32>
    %cst_62 = arith.constant dense<0.000000e+00> : vector<32xf32>
    %84 = vector.multi_reduction <add>, %83, %cst_62 [1] : vector<32x128xf32> to vector<32xf32>
    %85 = vector.shape_cast %84 : vector<32xf32> to vector<32x1xf32>
    %86 = arith.addf %72, %85 : vector<32x1xf32>
    %c0_63 = arith.constant 0 : index
    %c6 = arith.constant 6 : index
    %c0_64 = arith.constant 0 : index
    %c0_65 = arith.constant 0 : index
    %87 = vector.load %arg2[%c0_63, %c6, %c0_64, %c0_65] : memref<1x8x32x128xbf16, #tpu.memory_space<vmem>>, vector<1x1x32x128xbf16>
    %88 = vector.shape_cast %87 : vector<1x1x32x128xbf16> to vector<32x128xbf16>
    %cst_66 = arith.constant dense<0.000000e+00> : vector<32x128xf32>
    %89 = tpu.matmul %0, %88, %cst_66 {dimension_numbers = #tpu.dot_dimension_numbers<[1], [0], [0], [1], [0, 0, 1, 1], [], []>} : vector<32x32xbf16>, vector<32x128xbf16>, vector<32x128xf32> -> vector<32x128xf32>
    %90 = arith.truncf %89 : vector<32x128xf32> to vector<32x128xbf16>
    %c0_67 = arith.constant 0 : index
    %c6_68 = arith.constant 6 : index
    %c0_69 = arith.constant 0 : index
    %c0_70 = arith.constant 0 : index
    %91 = vector.load %arg4[%c0_67, %c6_68, %c0_69, %c0_70] : memref<1x8x32x128xbf16, #tpu.memory_space<vmem>>, vector<1x1x32x128xbf16>
    %92 = vector.shape_cast %91 : vector<1x1x32x128xbf16> to vector<32x128xbf16>
    %93 = vector.shape_cast %90 : vector<32x128xbf16> to vector<1x1x32x128xbf16>
    tpu.vector_store %arg4[%c0_67, %c6_68, %c0_69, %c0_70], %93 {strides = array<i32>} : memref<1x8x32x128xbf16, #tpu.memory_space<vmem>>, vector<1x1x32x128xbf16>,
    %cst_71 = arith.constant dense<0.000000e+00> : vector<32xf32>
    %94 = vector.multi_reduction <add>, %89, %cst_71 [1] : vector<32x128xf32> to vector<32xf32>
    %95 = vector.shape_cast %94 : vector<32xf32> to vector<32x1xf32>
    %96 = arith.addf %82, %95 : vector<32x1xf32>
    %97 = arith.mulf %89, %89 : vector<32x128xf32>
    %cst_72 = arith.constant dense<0.000000e+00> : vector<32xf32>
    %98 = vector.multi_reduction <add>, %97, %cst_72 [1] : vector<32x128xf32> to vector<32xf32>
    %99 = vector.shape_cast %98 : vector<32xf32> to vector<32x1xf32>
    %100 = arith.addf %86, %99 : vector<32x1xf32>
    %c0_73 = arith.constant 0 : index
    %c7 = arith.constant 7 : index
    %c0_74 = arith.constant 0 : index
    %c0_75 = arith.constant 0 : index
    %101 = vector.load %arg2[%c0_73, %c7, %c0_74, %c0_75] : memref<1x8x32x128xbf16, #tpu.memory_space<vmem>>, vector<1x1x32x128xbf16>
    %102 = vector.shape_cast %101 : vector<1x1x32x128xbf16> to vector<32x128xbf16>
    %cst_76 = arith.constant dense<0.000000e+00> : vector<32x128xf32>
    %103 = tpu.matmul %0, %102, %cst_76 {dimension_numbers = #tpu.dot_dimension_numbers<[1], [0], [0], [1], [0, 0, 1, 1], [], []>} : vector<32x32xbf16>, vector<32x128xbf16>, vector<32x128xf32> -> vector<32x128xf32>
    %104 = arith.truncf %103 : vector<32x128xf32> to vector<32x128xbf16>
    %c0_77 = arith.constant 0 : index
    %c7_78 = arith.constant 7 : index
    %c0_79 = arith.constant 0 : index
    %c0_80 = arith.constant 0 : index
    %105 = vector.load %arg4[%c0_77, %c7_78, %c0_79, %c0_80] : memref<1x8x32x128xbf16, #tpu.memory_space<vmem>>, vector<1x1x32x128xbf16>
    %106 = vector.shape_cast %105 : vector<1x1x32x128xbf16> to vector<32x128xbf16>
    %107 = vector.shape_cast %104 : vector<32x128xbf16> to vector<1x1x32x128xbf16>
    tpu.vector_store %arg4[%c0_77, %c7_78, %c0_79, %c0_80], %107 {strides = array<i32>} : memref<1x8x32x128xbf16, #tpu.memory_space<vmem>>, vector<1x1x32x128xbf16>,
    %cst_81 = arith.constant dense<0.000000e+00> : vector<32xf32>
    %108 = vector.multi_reduction <add>, %103, %cst_81 [1] : vector<32x128xf32> to vector<32xf32>
    %109 = vector.shape_cast %108 : vector<32xf32> to vector<32x1xf32>
    %110 = arith.addf %96, %109 : vector<32x1xf32>
    %111 = arith.mulf %103, %103 : vector<32x128xf32>
    %cst_82 = arith.constant dense<0.000000e+00> : vector<32xf32>
    %112 = vector.multi_reduction <add>, %111, %cst_82 [1] : vector<32x128xf32> to vector<32xf32>
    %113 = vector.shape_cast %112 : vector<32xf32> to vector<32x1xf32>
    %114 = arith.addf %100, %113 : vector<32x1xf32>
    %c0_83 = arith.constant 0 : index
    %c0_84 = arith.constant 0 : index
    %c0_85 = arith.constant 0 : index
    %c0_86 = arith.constant 0 : index
    %c0_87 = arith.constant 0 : index
    %115 = vector.load %arg5[%c0_83, %c0_84, %c0_85, %c0_86, %c0_87] : memref<1x1x2x32x1xf32, #tpu.memory_space<vmem>>, vector<1x1x1x32x1xf32>
    %116 = vector.shape_cast %115 : vector<1x1x1x32x1xf32> to vector<32x1xf32>
    %117 = vector.shape_cast %110 : vector<32x1xf32> to vector<1x1x1x32x1xf32>
    tpu.vector_store %arg5[%c0_83, %c0_84, %c0_85, %c0_86, %c0_87], %117 {strides = array<i32>} : memref<1x1x2x32x1xf32, #tpu.memory_space<vmem>>, vector<1x1x1x32x1xf32>,
    %c0_88 = arith.constant 0 : index
    %c0_89 = arith.constant 0 : index
    %c1_90 = arith.constant 1 : index
    %c0_91 = arith.constant 0 : index
    %c0_92 = arith.constant 0 : index
    %118 = vector.load %arg5[%c0_88, %c0_89, %c1_90, %c0_91, %c0_92] : memref<1x1x2x32x1xf32, #tpu.memory_space<vmem>>, vector<1x1x1x32x1xf32>
    %119 = vector.shape_cast %118 : vector<1x1x1x32x1xf32> to vector<32x1xf32>
    %120 = vector.shape_cast %114 : vector<32x1xf32> to vector<1x1x1x32x1xf32>
    tpu.vector_store %arg5[%c0_88, %c0_89, %c1_90, %c0_91, %c0_92], %120 {strides = array<i32>} : memref<1x1x2x32x1xf32, #tpu.memory_space<vmem>>, vector<1x1x1x32x1xf32>,
    return
  }
  func.func @transform_0(%arg0: i32, %arg1: i32) -> (i32, i32, i32, i32) {
    %c0_i32 = arith.constant 0 : i32
    %c0_i32_0 = arith.constant 0 : i32
    %c0_i32_1 = arith.constant 0 : i32
    return %arg0, %c0_i32, %c0_i32_0, %arg1 : i32, i32, i32, i32
  }
  func.func @transform_1(%arg0: i32, %arg1: i32) -> (i32, i32) {
    %c0_i32 = arith.constant 0 : i32
    %c0_i32_0 = arith.constant 0 : i32
    %c0_i32_1 = arith.constant 0 : i32
    return %c0_i32, %c0_i32_0 : i32, i32
  }
  func.func @transform_2(%arg0: i32, %arg1: i32) -> (i32, i32, i32, i32) {
    %c0_i32 = arith.constant 0 : i32
    %c0_i32_0 = arith.constant 0 : i32
    %c0_i32_1 = arith.constant 0 : i32
    return %arg0, %c0_i32, %c0_i32_0, %arg1 : i32, i32, i32, i32
  }
  func.func @transform_3(%arg0: i32, %arg1: i32) -> (i32, i32, i32, i32, i32) {
    %c0_i32 = arith.constant 0 : i32
    %c0_i32_0 = arith.constant 0 : i32
    %c0_i32_1 = arith.constant 0 : i32
    %c0_i32_2 = arith.constant 0 : i32
    return %arg0, %arg1, %c0_i32, %c0_i32_0, %c0_i32_1 : i32, i32, i32, i32, i32
  }
}

module attributes {stable_mosaic.version = 11 : i64} {
  func.func @_conv2_max_kernel(%arg0: i32, %arg1: i32, %arg2: memref<1x8x32x128xbf16, #tpu.memory_space<vmem>>, %arg3: memref<1x32x1xf32, #tpu.memory_space<vmem>>, %arg4: memref<1x32x1xf32, #tpu.memory_space<vmem>>, %arg5: memref<64x32xbf16, #tpu.memory_space<vmem>>, %arg6: memref<1x2x64x128xf32, #tpu.memory_space<vmem>>, %arg7: memref<1x1x2x64x1xf32, #tpu.memory_space<vmem>>) attributes {dimension_semantics = [#tpu.dimension_semantics<parallel>, #tpu.dimension_semantics<parallel>], iteration_bounds = array<i64: 2, 1>, scalar_prefetch = 0 : i64, scratch_operands = 0 : i64, tpu.core_type = #tpu.core_type<tc>, window_params = [{transform_indices = @transform_0, window_bounds = array<i64: 1, 8, 32, 128>}, {transform_indices = @transform_1, window_bounds = array<i64: 1, 32, 1>}, {transform_indices = @transform_2, window_bounds = array<i64: 1, 32, 1>}, {pipeline_mode = #tpu.pipeline_mode<synchronous>, transform_indices = @transform_3, window_bounds = array<i64: 64, 32>}, {transform_indices = @transform_4, window_bounds = array<i64: 1, 2, 64, 128>}, {transform_indices = @transform_5, window_bounds = array<i64: 1, 1, 2, 64, 1>}]} {
    %c0 = arith.constant 0 : index
    %c0_0 = arith.constant 0 : index
    %0 = vector.load %arg5[%c0, %c0_0] : memref<64x32xbf16, #tpu.memory_space<vmem>>, vector<64x32xbf16>
    %c0_1 = arith.constant 0 : index
    %c0_2 = arith.constant 0 : index
    %c0_3 = arith.constant 0 : index
    %1 = vector.load %arg3[%c0_1, %c0_2, %c0_3] : memref<1x32x1xf32, #tpu.memory_space<vmem>>, vector<1x32x1xf32>
    %2 = vector.shape_cast %1 : vector<1x32x1xf32> to vector<32x1xf32>
    %c0_4 = arith.constant 0 : index
    %c0_5 = arith.constant 0 : index
    %c0_6 = arith.constant 0 : index
    %3 = vector.load %arg4[%c0_4, %c0_5, %c0_6] : memref<1x32x1xf32, #tpu.memory_space<vmem>>, vector<1x32x1xf32>
    %4 = vector.shape_cast %3 : vector<1x32x1xf32> to vector<32x1xf32>
    %5 = tpu.iota {dimensions = array<i32: 1>} : vector<1x128xi32>
    %c128_i32 = arith.constant 128 : i32
    %6 = arith.muli %arg1, %c128_i32 : i32
    %7 = vector.broadcast %6 : i32 to vector<1x128xi32>
    %8 = arith.addi %7, %5 : vector<1x128xi32>
    %c16_i32 = arith.constant 16 : i32
    %9 = vector.broadcast %c16_i32 : i32 to vector<1x128xi32>
    %10 = arith.cmpi slt, %8, %9 : vector<1x128xi32>
    %cst = arith.constant 0.000000e+00 : f32
    %11 = vector.broadcast %cst : f32 to vector<64x1xf32>
    %cst_7 = arith.constant 0.000000e+00 : f32
    %12 = vector.broadcast %cst_7 : f32 to vector<64x1xf32>
    %c0_8 = arith.constant 0 : index
    %c0_9 = arith.constant 0 : index
    %c0_10 = arith.constant 0 : index
    %c0_11 = arith.constant 0 : index
    %13 = vector.load %arg2[%c0_8, %c0_9, %c0_10, %c0_11] : memref<1x8x32x128xbf16, #tpu.memory_space<vmem>>, vector<1x1x32x128xbf16>
    %14 = vector.shape_cast %13 : vector<1x1x32x128xbf16> to vector<32x128xbf16>
    %15 = arith.extf %14 : vector<32x128xbf16> to vector<32x128xf32>
    %16 = vector.broadcast %2 : vector<32x1xf32> to vector<32x128xf32>
    %17 = arith.mulf %15, %16 : vector<32x128xf32>
    %18 = vector.broadcast %4 : vector<32x1xf32> to vector<32x128xf32>
    %19 = arith.addf %17, %18 : vector<32x128xf32>
    %cst_12 = arith.constant 0.000000e+00 : f32
    %20 = vector.broadcast %cst_12 : f32 to vector<32x128xf32>
    %21 = arith.maximumf %19, %20 : vector<32x128xf32>
    %cst_13 = arith.constant 0.000000e+00 : f32
    %22 = vector.shape_cast %10 : vector<1x128xi1> to vector<1x128xi1>
    %23 = vector.broadcast %22 : vector<1x128xi1> to vector<32x128xi1>
    %24 = vector.broadcast %cst_13 : f32 to vector<32x128xf32>
    %25 = arith.select %23, %21, %24 : vector<32x128xi1>, vector<32x128xf32>
    %26 = arith.truncf %25 : vector<32x128xf32> to vector<32x128xbf16>
    %cst_14 = arith.constant dense<0.000000e+00> : vector<64x128xf32>
    %27 = tpu.matmul %0, %26, %cst_14 {dimension_numbers = #tpu.dot_dimension_numbers<[1], [0], [0], [1], [0, 0, 1, 1], [], []>} : vector<64x32xbf16>, vector<32x128xbf16>, vector<64x128xf32> -> vector<64x128xf32>
    %cst_15 = arith.constant dense<0.000000e+00> : vector<64xf32>
    %28 = vector.multi_reduction <add>, %27, %cst_15 [1] : vector<64x128xf32> to vector<64xf32>
    %29 = vector.shape_cast %28 : vector<64xf32> to vector<64x1xf32>
    %30 = arith.addf %11, %29 : vector<64x1xf32>
    %31 = arith.mulf %27, %27 : vector<64x128xf32>
    %cst_16 = arith.constant dense<0.000000e+00> : vector<64xf32>
    %32 = vector.multi_reduction <add>, %31, %cst_16 [1] : vector<64x128xf32> to vector<64xf32>
    %33 = vector.shape_cast %32 : vector<64xf32> to vector<64x1xf32>
    %34 = arith.addf %12, %33 : vector<64x1xf32>
    %c0_17 = arith.constant 0 : index
    %c1 = arith.constant 1 : index
    %c0_18 = arith.constant 0 : index
    %c0_19 = arith.constant 0 : index
    %35 = vector.load %arg2[%c0_17, %c1, %c0_18, %c0_19] : memref<1x8x32x128xbf16, #tpu.memory_space<vmem>>, vector<1x1x32x128xbf16>
    %36 = vector.shape_cast %35 : vector<1x1x32x128xbf16> to vector<32x128xbf16>
    %37 = arith.extf %36 : vector<32x128xbf16> to vector<32x128xf32>
    %38 = vector.broadcast %2 : vector<32x1xf32> to vector<32x128xf32>
    %39 = arith.mulf %37, %38 : vector<32x128xf32>
    %40 = vector.broadcast %4 : vector<32x1xf32> to vector<32x128xf32>
    %41 = arith.addf %39, %40 : vector<32x128xf32>
    %cst_20 = arith.constant 0.000000e+00 : f32
    %42 = vector.broadcast %cst_20 : f32 to vector<32x128xf32>
    %43 = arith.maximumf %41, %42 : vector<32x128xf32>
    %cst_21 = arith.constant 0.000000e+00 : f32
    %44 = vector.shape_cast %10 : vector<1x128xi1> to vector<1x128xi1>
    %45 = vector.broadcast %44 : vector<1x128xi1> to vector<32x128xi1>
    %46 = vector.broadcast %cst_21 : f32 to vector<32x128xf32>
    %47 = arith.select %45, %43, %46 : vector<32x128xi1>, vector<32x128xf32>
    %48 = arith.truncf %47 : vector<32x128xf32> to vector<32x128xbf16>
    %cst_22 = arith.constant dense<0.000000e+00> : vector<64x128xf32>
    %49 = tpu.matmul %0, %48, %cst_22 {dimension_numbers = #tpu.dot_dimension_numbers<[1], [0], [0], [1], [0, 0, 1, 1], [], []>} : vector<64x32xbf16>, vector<32x128xbf16>, vector<64x128xf32> -> vector<64x128xf32>
    %cst_23 = arith.constant dense<0.000000e+00> : vector<64xf32>
    %50 = vector.multi_reduction <add>, %49, %cst_23 [1] : vector<64x128xf32> to vector<64xf32>
    %51 = vector.shape_cast %50 : vector<64xf32> to vector<64x1xf32>
    %52 = arith.addf %30, %51 : vector<64x1xf32>
    %53 = arith.mulf %49, %49 : vector<64x128xf32>
    %cst_24 = arith.constant dense<0.000000e+00> : vector<64xf32>
    %54 = vector.multi_reduction <add>, %53, %cst_24 [1] : vector<64x128xf32> to vector<64xf32>
    %55 = vector.shape_cast %54 : vector<64xf32> to vector<64x1xf32>
    %56 = arith.addf %34, %55 : vector<64x1xf32>
    %57 = arith.maximumf %27, %49 : vector<64x128xf32>
    %58 = arith.minimumf %27, %49 : vector<64x128xf32>
    %c0_25 = arith.constant 0 : index
    %c2 = arith.constant 2 : index
    %c0_26 = arith.constant 0 : index
    %c0_27 = arith.constant 0 : index
    %59 = vector.load %arg2[%c0_25, %c2, %c0_26, %c0_27] : memref<1x8x32x128xbf16, #tpu.memory_space<vmem>>, vector<1x1x32x128xbf16>
    %60 = vector.shape_cast %59 : vector<1x1x32x128xbf16> to vector<32x128xbf16>
    %61 = arith.extf %60 : vector<32x128xbf16> to vector<32x128xf32>
    %62 = vector.broadcast %2 : vector<32x1xf32> to vector<32x128xf32>
    %63 = arith.mulf %61, %62 : vector<32x128xf32>
    %64 = vector.broadcast %4 : vector<32x1xf32> to vector<32x128xf32>
    %65 = arith.addf %63, %64 : vector<32x128xf32>
    %cst_28 = arith.constant 0.000000e+00 : f32
    %66 = vector.broadcast %cst_28 : f32 to vector<32x128xf32>
    %67 = arith.maximumf %65, %66 : vector<32x128xf32>
    %cst_29 = arith.constant 0.000000e+00 : f32
    %68 = vector.shape_cast %10 : vector<1x128xi1> to vector<1x128xi1>
    %69 = vector.broadcast %68 : vector<1x128xi1> to vector<32x128xi1>
    %70 = vector.broadcast %cst_29 : f32 to vector<32x128xf32>
    %71 = arith.select %69, %67, %70 : vector<32x128xi1>, vector<32x128xf32>
    %72 = arith.truncf %71 : vector<32x128xf32> to vector<32x128xbf16>
    %cst_30 = arith.constant dense<0.000000e+00> : vector<64x128xf32>
    %73 = tpu.matmul %0, %72, %cst_30 {dimension_numbers = #tpu.dot_dimension_numbers<[1], [0], [0], [1], [0, 0, 1, 1], [], []>} : vector<64x32xbf16>, vector<32x128xbf16>, vector<64x128xf32> -> vector<64x128xf32>
    %cst_31 = arith.constant dense<0.000000e+00> : vector<64xf32>
    %74 = vector.multi_reduction <add>, %73, %cst_31 [1] : vector<64x128xf32> to vector<64xf32>
    %75 = vector.shape_cast %74 : vector<64xf32> to vector<64x1xf32>
    %76 = arith.addf %52, %75 : vector<64x1xf32>
    %77 = arith.mulf %73, %73 : vector<64x128xf32>
    %cst_32 = arith.constant dense<0.000000e+00> : vector<64xf32>
    %78 = vector.multi_reduction <add>, %77, %cst_32 [1] : vector<64x128xf32> to vector<64xf32>
    %79 = vector.shape_cast %78 : vector<64xf32> to vector<64x1xf32>
    %80 = arith.addf %56, %79 : vector<64x1xf32>
    %81 = arith.maximumf %57, %73 : vector<64x128xf32>
    %82 = arith.minimumf %58, %73 : vector<64x128xf32>
    %c0_33 = arith.constant 0 : index
    %c3 = arith.constant 3 : index
    %c0_34 = arith.constant 0 : index
    %c0_35 = arith.constant 0 : index
    %83 = vector.load %arg2[%c0_33, %c3, %c0_34, %c0_35] : memref<1x8x32x128xbf16, #tpu.memory_space<vmem>>, vector<1x1x32x128xbf16>
    %84 = vector.shape_cast %83 : vector<1x1x32x128xbf16> to vector<32x128xbf16>
    %85 = arith.extf %84 : vector<32x128xbf16> to vector<32x128xf32>
    %86 = vector.broadcast %2 : vector<32x1xf32> to vector<32x128xf32>
    %87 = arith.mulf %85, %86 : vector<32x128xf32>
    %88 = vector.broadcast %4 : vector<32x1xf32> to vector<32x128xf32>
    %89 = arith.addf %87, %88 : vector<32x128xf32>
    %cst_36 = arith.constant 0.000000e+00 : f32
    %90 = vector.broadcast %cst_36 : f32 to vector<32x128xf32>
    %91 = arith.maximumf %89, %90 : vector<32x128xf32>
    %cst_37 = arith.constant 0.000000e+00 : f32
    %92 = vector.shape_cast %10 : vector<1x128xi1> to vector<1x128xi1>
    %93 = vector.broadcast %92 : vector<1x128xi1> to vector<32x128xi1>
    %94 = vector.broadcast %cst_37 : f32 to vector<32x128xf32>
    %95 = arith.select %93, %91, %94 : vector<32x128xi1>, vector<32x128xf32>
    %96 = arith.truncf %95 : vector<32x128xf32> to vector<32x128xbf16>
    %cst_38 = arith.constant dense<0.000000e+00> : vector<64x128xf32>
    %97 = tpu.matmul %0, %96, %cst_38 {dimension_numbers = #tpu.dot_dimension_numbers<[1], [0], [0], [1], [0, 0, 1, 1], [], []>} : vector<64x32xbf16>, vector<32x128xbf16>, vector<64x128xf32> -> vector<64x128xf32>
    %cst_39 = arith.constant dense<0.000000e+00> : vector<64xf32>
    %98 = vector.multi_reduction <add>, %97, %cst_39 [1] : vector<64x128xf32> to vector<64xf32>
    %99 = vector.shape_cast %98 : vector<64xf32> to vector<64x1xf32>
    %100 = arith.addf %76, %99 : vector<64x1xf32>
    %101 = arith.mulf %97, %97 : vector<64x128xf32>
    %cst_40 = arith.constant dense<0.000000e+00> : vector<64xf32>
    %102 = vector.multi_reduction <add>, %101, %cst_40 [1] : vector<64x128xf32> to vector<64xf32>
    %103 = vector.shape_cast %102 : vector<64xf32> to vector<64x1xf32>
    %104 = arith.addf %80, %103 : vector<64x1xf32>
    %105 = arith.maximumf %81, %97 : vector<64x128xf32>
    %106 = arith.minimumf %82, %97 : vector<64x128xf32>
    %c0_41 = arith.constant 0 : index
    %c4 = arith.constant 4 : index
    %c0_42 = arith.constant 0 : index
    %c0_43 = arith.constant 0 : index
    %107 = vector.load %arg2[%c0_41, %c4, %c0_42, %c0_43] : memref<1x8x32x128xbf16, #tpu.memory_space<vmem>>, vector<1x1x32x128xbf16>
    %108 = vector.shape_cast %107 : vector<1x1x32x128xbf16> to vector<32x128xbf16>
    %109 = arith.extf %108 : vector<32x128xbf16> to vector<32x128xf32>
    %110 = vector.broadcast %2 : vector<32x1xf32> to vector<32x128xf32>
    %111 = arith.mulf %109, %110 : vector<32x128xf32>
    %112 = vector.broadcast %4 : vector<32x1xf32> to vector<32x128xf32>
    %113 = arith.addf %111, %112 : vector<32x128xf32>
    %cst_44 = arith.constant 0.000000e+00 : f32
    %114 = vector.broadcast %cst_44 : f32 to vector<32x128xf32>
    %115 = arith.maximumf %113, %114 : vector<32x128xf32>
    %cst_45 = arith.constant 0.000000e+00 : f32
    %116 = vector.shape_cast %10 : vector<1x128xi1> to vector<1x128xi1>
    %117 = vector.broadcast %116 : vector<1x128xi1> to vector<32x128xi1>
    %118 = vector.broadcast %cst_45 : f32 to vector<32x128xf32>
    %119 = arith.select %117, %115, %118 : vector<32x128xi1>, vector<32x128xf32>
    %120 = arith.truncf %119 : vector<32x128xf32> to vector<32x128xbf16>
    %cst_46 = arith.constant dense<0.000000e+00> : vector<64x128xf32>
    %121 = tpu.matmul %0, %120, %cst_46 {dimension_numbers = #tpu.dot_dimension_numbers<[1], [0], [0], [1], [0, 0, 1, 1], [], []>} : vector<64x32xbf16>, vector<32x128xbf16>, vector<64x128xf32> -> vector<64x128xf32>
    %cst_47 = arith.constant dense<0.000000e+00> : vector<64xf32>
    %122 = vector.multi_reduction <add>, %121, %cst_47 [1] : vector<64x128xf32> to vector<64xf32>
    %123 = vector.shape_cast %122 : vector<64xf32> to vector<64x1xf32>
    %124 = arith.addf %100, %123 : vector<64x1xf32>
    %125 = arith.mulf %121, %121 : vector<64x128xf32>
    %cst_48 = arith.constant dense<0.000000e+00> : vector<64xf32>
    %126 = vector.multi_reduction <add>, %125, %cst_48 [1] : vector<64x128xf32> to vector<64xf32>
    %127 = vector.shape_cast %126 : vector<64xf32> to vector<64x1xf32>
    %128 = arith.addf %104, %127 : vector<64x1xf32>
    %129 = arith.maximumf %105, %121 : vector<64x128xf32>
    %130 = arith.minimumf %106, %121 : vector<64x128xf32>
    %c0_49 = arith.constant 0 : index
    %c5 = arith.constant 5 : index
    %c0_50 = arith.constant 0 : index
    %c0_51 = arith.constant 0 : index
    %131 = vector.load %arg2[%c0_49, %c5, %c0_50, %c0_51] : memref<1x8x32x128xbf16, #tpu.memory_space<vmem>>, vector<1x1x32x128xbf16>
    %132 = vector.shape_cast %131 : vector<1x1x32x128xbf16> to vector<32x128xbf16>
    %133 = arith.extf %132 : vector<32x128xbf16> to vector<32x128xf32>
    %134 = vector.broadcast %2 : vector<32x1xf32> to vector<32x128xf32>
    %135 = arith.mulf %133, %134 : vector<32x128xf32>
    %136 = vector.broadcast %4 : vector<32x1xf32> to vector<32x128xf32>
    %137 = arith.addf %135, %136 : vector<32x128xf32>
    %cst_52 = arith.constant 0.000000e+00 : f32
    %138 = vector.broadcast %cst_52 : f32 to vector<32x128xf32>
    %139 = arith.maximumf %137, %138 : vector<32x128xf32>
    %cst_53 = arith.constant 0.000000e+00 : f32
    %140 = vector.shape_cast %10 : vector<1x128xi1> to vector<1x128xi1>
    %141 = vector.broadcast %140 : vector<1x128xi1> to vector<32x128xi1>
    %142 = vector.broadcast %cst_53 : f32 to vector<32x128xf32>
    %143 = arith.select %141, %139, %142 : vector<32x128xi1>, vector<32x128xf32>
    %144 = arith.truncf %143 : vector<32x128xf32> to vector<32x128xbf16>
    %cst_54 = arith.constant dense<0.000000e+00> : vector<64x128xf32>
    %145 = tpu.matmul %0, %144, %cst_54 {dimension_numbers = #tpu.dot_dimension_numbers<[1], [0], [0], [1], [0, 0, 1, 1], [], []>} : vector<64x32xbf16>, vector<32x128xbf16>, vector<64x128xf32> -> vector<64x128xf32>
    %cst_55 = arith.constant dense<0.000000e+00> : vector<64xf32>
    %146 = vector.multi_reduction <add>, %145, %cst_55 [1] : vector<64x128xf32> to vector<64xf32>
    %147 = vector.shape_cast %146 : vector<64xf32> to vector<64x1xf32>
    %148 = arith.addf %124, %147 : vector<64x1xf32>
    %149 = arith.mulf %145, %145 : vector<64x128xf32>
    %cst_56 = arith.constant dense<0.000000e+00> : vector<64xf32>
    %150 = vector.multi_reduction <add>, %149, %cst_56 [1] : vector<64x128xf32> to vector<64xf32>
    %151 = vector.shape_cast %150 : vector<64xf32> to vector<64x1xf32>
    %152 = arith.addf %128, %151 : vector<64x1xf32>
    %153 = arith.maximumf %129, %145 : vector<64x128xf32>
    %154 = arith.minimumf %130, %145 : vector<64x128xf32>
    %c0_57 = arith.constant 0 : index
    %c6 = arith.constant 6 : index
    %c0_58 = arith.constant 0 : index
    %c0_59 = arith.constant 0 : index
    %155 = vector.load %arg2[%c0_57, %c6, %c0_58, %c0_59] : memref<1x8x32x128xbf16, #tpu.memory_space<vmem>>, vector<1x1x32x128xbf16>
    %156 = vector.shape_cast %155 : vector<1x1x32x128xbf16> to vector<32x128xbf16>
    %157 = arith.extf %156 : vector<32x128xbf16> to vector<32x128xf32>
    %158 = vector.broadcast %2 : vector<32x1xf32> to vector<32x128xf32>
    %159 = arith.mulf %157, %158 : vector<32x128xf32>
    %160 = vector.broadcast %4 : vector<32x1xf32> to vector<32x128xf32>
    %161 = arith.addf %159, %160 : vector<32x128xf32>
    %cst_60 = arith.constant 0.000000e+00 : f32
    %162 = vector.broadcast %cst_60 : f32 to vector<32x128xf32>
    %163 = arith.maximumf %161, %162 : vector<32x128xf32>
    %cst_61 = arith.constant 0.000000e+00 : f32
    %164 = vector.shape_cast %10 : vector<1x128xi1> to vector<1x128xi1>
    %165 = vector.broadcast %164 : vector<1x128xi1> to vector<32x128xi1>
    %166 = vector.broadcast %cst_61 : f32 to vector<32x128xf32>
    %167 = arith.select %165, %163, %166 : vector<32x128xi1>, vector<32x128xf32>
    %168 = arith.truncf %167 : vector<32x128xf32> to vector<32x128xbf16>
    %cst_62 = arith.constant dense<0.000000e+00> : vector<64x128xf32>
    %169 = tpu.matmul %0, %168, %cst_62 {dimension_numbers = #tpu.dot_dimension_numbers<[1], [0], [0], [1], [0, 0, 1, 1], [], []>} : vector<64x32xbf16>, vector<32x128xbf16>, vector<64x128xf32> -> vector<64x128xf32>
    %cst_63 = arith.constant dense<0.000000e+00> : vector<64xf32>
    %170 = vector.multi_reduction <add>, %169, %cst_63 [1] : vector<64x128xf32> to vector<64xf32>
    %171 = vector.shape_cast %170 : vector<64xf32> to vector<64x1xf32>
    %172 = arith.addf %148, %171 : vector<64x1xf32>
    %173 = arith.mulf %169, %169 : vector<64x128xf32>
    %cst_64 = arith.constant dense<0.000000e+00> : vector<64xf32>
    %174 = vector.multi_reduction <add>, %173, %cst_64 [1] : vector<64x128xf32> to vector<64xf32>
    %175 = vector.shape_cast %174 : vector<64xf32> to vector<64x1xf32>
    %176 = arith.addf %152, %175 : vector<64x1xf32>
    %177 = arith.maximumf %153, %169 : vector<64x128xf32>
    %178 = arith.minimumf %154, %169 : vector<64x128xf32>
    %c0_65 = arith.constant 0 : index
    %c7 = arith.constant 7 : index
    %c0_66 = arith.constant 0 : index
    %c0_67 = arith.constant 0 : index
    %179 = vector.load %arg2[%c0_65, %c7, %c0_66, %c0_67] : memref<1x8x32x128xbf16, #tpu.memory_space<vmem>>, vector<1x1x32x128xbf16>
    %180 = vector.shape_cast %179 : vector<1x1x32x128xbf16> to vector<32x128xbf16>
    %181 = arith.extf %180 : vector<32x128xbf16> to vector<32x128xf32>
    %182 = vector.broadcast %2 : vector<32x1xf32> to vector<32x128xf32>
    %183 = arith.mulf %181, %182 : vector<32x128xf32>
    %184 = vector.broadcast %4 : vector<32x1xf32> to vector<32x128xf32>
    %185 = arith.addf %183, %184 : vector<32x128xf32>
    %cst_68 = arith.constant 0.000000e+00 : f32
    %186 = vector.broadcast %cst_68 : f32 to vector<32x128xf32>
    %187 = arith.maximumf %185, %186 : vector<32x128xf32>
    %cst_69 = arith.constant 0.000000e+00 : f32
    %188 = vector.shape_cast %10 : vector<1x128xi1> to vector<1x128xi1>
    %189 = vector.broadcast %188 : vector<1x128xi1> to vector<32x128xi1>
    %190 = vector.broadcast %cst_69 : f32 to vector<32x128xf32>
    %191 = arith.select %189, %187, %190 : vector<32x128xi1>, vector<32x128xf32>
    %192 = arith.truncf %191 : vector<32x128xf32> to vector<32x128xbf16>
    %cst_70 = arith.constant dense<0.000000e+00> : vector<64x128xf32>
    %193 = tpu.matmul %0, %192, %cst_70 {dimension_numbers = #tpu.dot_dimension_numbers<[1], [0], [0], [1], [0, 0, 1, 1], [], []>} : vector<64x32xbf16>, vector<32x128xbf16>, vector<64x128xf32> -> vector<64x128xf32>
    %cst_71 = arith.constant dense<0.000000e+00> : vector<64xf32>
    %194 = vector.multi_reduction <add>, %193, %cst_71 [1] : vector<64x128xf32> to vector<64xf32>
    %195 = vector.shape_cast %194 : vector<64xf32> to vector<64x1xf32>
    %196 = arith.addf %172, %195 : vector<64x1xf32>
    %197 = arith.mulf %193, %193 : vector<64x128xf32>
    %cst_72 = arith.constant dense<0.000000e+00> : vector<64xf32>
    %198 = vector.multi_reduction <add>, %197, %cst_72 [1] : vector<64x128xf32> to vector<64xf32>
    %199 = vector.shape_cast %198 : vector<64xf32> to vector<64x1xf32>
    %200 = arith.addf %176, %199 : vector<64x1xf32>
    %201 = arith.maximumf %177, %193 : vector<64x128xf32>
    %202 = arith.minimumf %178, %193 : vector<64x128xf32>
    %c0_73 = arith.constant 0 : index
    %c0_74 = arith.constant 0 : index
    %c0_75 = arith.constant 0 : index
    %c0_76 = arith.constant 0 : index
    %203 = vector.load %arg6[%c0_73, %c0_74, %c0_75, %c0_76] : memref<1x2x64x128xf32, #tpu.memory_space<vmem>>, vector<1x1x64x128xf32>
    %204 = vector.shape_cast %203 : vector<1x1x64x128xf32> to vector<64x128xf32>
    %205 = vector.shape_cast %201 : vector<64x128xf32> to vector<1x1x64x128xf32>
    tpu.vector_store %arg6[%c0_73, %c0_74, %c0_75, %c0_76], %205 {strides = array<i32>} : memref<1x2x64x128xf32, #tpu.memory_space<vmem>>, vector<1x1x64x128xf32>,
    %c0_77 = arith.constant 0 : index
    %c1_78 = arith.constant 1 : index
    %c0_79 = arith.constant 0 : index
    %c0_80 = arith.constant 0 : index
    %206 = vector.load %arg6[%c0_77, %c1_78, %c0_79, %c0_80] : memref<1x2x64x128xf32, #tpu.memory_space<vmem>>, vector<1x1x64x128xf32>
    %207 = vector.shape_cast %206 : vector<1x1x64x128xf32> to vector<64x128xf32>
    %208 = vector.shape_cast %202 : vector<64x128xf32> to vector<1x1x64x128xf32>
    tpu.vector_store %arg6[%c0_77, %c1_78, %c0_79, %c0_80], %208 {strides = array<i32>} : memref<1x2x64x128xf32, #tpu.memory_space<vmem>>, vector<1x1x64x128xf32>,
    %c0_81 = arith.constant 0 : index
    %c0_82 = arith.constant 0 : index
    %c0_83 = arith.constant 0 : index
    %c0_84 = arith.constant 0 : index
    %c0_85 = arith.constant 0 : index
    %209 = vector.load %arg7[%c0_81, %c0_82, %c0_83, %c0_84, %c0_85] : memref<1x1x2x64x1xf32, #tpu.memory_space<vmem>>, vector<1x1x1x64x1xf32>
    %210 = vector.shape_cast %209 : vector<1x1x1x64x1xf32> to vector<64x1xf32>
    %211 = vector.shape_cast %196 : vector<64x1xf32> to vector<1x1x1x64x1xf32>
    tpu.vector_store %arg7[%c0_81, %c0_82, %c0_83, %c0_84, %c0_85], %211 {strides = array<i32>} : memref<1x1x2x64x1xf32, #tpu.memory_space<vmem>>, vector<1x1x1x64x1xf32>,
    %c0_86 = arith.constant 0 : index
    %c0_87 = arith.constant 0 : index
    %c1_88 = arith.constant 1 : index
    %c0_89 = arith.constant 0 : index
    %c0_90 = arith.constant 0 : index
    %212 = vector.load %arg7[%c0_86, %c0_87, %c1_88, %c0_89, %c0_90] : memref<1x1x2x64x1xf32, #tpu.memory_space<vmem>>, vector<1x1x1x64x1xf32>
    %213 = vector.shape_cast %212 : vector<1x1x1x64x1xf32> to vector<64x1xf32>
    %214 = vector.shape_cast %200 : vector<64x1xf32> to vector<1x1x1x64x1xf32>
    tpu.vector_store %arg7[%c0_86, %c0_87, %c1_88, %c0_89, %c0_90], %214 {strides = array<i32>} : memref<1x1x2x64x1xf32, #tpu.memory_space<vmem>>, vector<1x1x1x64x1xf32>,
    return
  }
  func.func @transform_0(%arg0: i32, %arg1: i32) -> (i32, i32, i32, i32) {
    %c0_i32 = arith.constant 0 : i32
    %c0_i32_0 = arith.constant 0 : i32
    %c0_i32_1 = arith.constant 0 : i32
    return %arg0, %c0_i32, %c0_i32_0, %arg1 : i32, i32, i32, i32
  }
  func.func @transform_1(%arg0: i32, %arg1: i32) -> (i32, i32, i32) {
    %c0_i32 = arith.constant 0 : i32
    %c0_i32_0 = arith.constant 0 : i32
    %c0_i32_1 = arith.constant 0 : i32
    return %arg0, %c0_i32, %c0_i32_0 : i32, i32, i32
  }
  func.func @transform_2(%arg0: i32, %arg1: i32) -> (i32, i32, i32) {
    %c0_i32 = arith.constant 0 : i32
    %c0_i32_0 = arith.constant 0 : i32
    %c0_i32_1 = arith.constant 0 : i32
    return %arg0, %c0_i32, %c0_i32_0 : i32, i32, i32
  }
  func.func @transform_3(%arg0: i32, %arg1: i32) -> (i32, i32) {
    %c0_i32 = arith.constant 0 : i32
    %c0_i32_0 = arith.constant 0 : i32
    %c0_i32_1 = arith.constant 0 : i32
    return %c0_i32, %c0_i32_0 : i32, i32
  }
  func.func @transform_4(%arg0: i32, %arg1: i32) -> (i32, i32, i32, i32) {
    %c0_i32 = arith.constant 0 : i32
    %c0_i32_0 = arith.constant 0 : i32
    %c0_i32_1 = arith.constant 0 : i32
    return %arg0, %c0_i32, %c0_i32_0, %arg1 : i32, i32, i32, i32
  }
  func.func @transform_5(%arg0: i32, %arg1: i32) -> (i32, i32, i32, i32, i32) {
    %c0_i32 = arith.constant 0 : i32
    %c0_i32_0 = arith.constant 0 : i32
    %c0_i32_1 = arith.constant 0 : i32
    %c0_i32_2 = arith.constant 0 : i32
    return %arg0, %arg1, %c0_i32, %c0_i32_0, %c0_i32_1 : i32, i32, i32, i32, i32
  }
}

</mosaic_0001>

<bundles_post_ra>
// kernel: local_feature_forward.2
= control target key start
LH: loop header
LB: loop body
LE: loop exit
PB: predicated region body
PF: predicated region fallthrough
CT: control target
= control target key end

     0   :  { %s1762_s12 = smov 0   ;;  %s1764_s13 = smov 0   ;;  %s2060_s0 = inlined_call_operand.vmem [shape: bf16[2,8,32,128], index: 0, kind: input, shape index: {}]   ;;  %s2061_s1 = inlined_call_operand.vmem [shape: bf16[32,32], index: 1, kind: input, shape index: {}]   ;;  %s2062_s2 = inlined_call_operand.vmem [shape: bf16[2,8,32,128], index: 2, kind: output, shape index: {0}]   ;;  %s2063_s3 = inlined_call_operand.vmem [shape: f32[2,1,2,32,1], index: 3, kind: output, shape index: {1}]  }
   0x1   :  { %s1766_s14 = smov 0  }
   0x2 LB: > { %s26_s15 = sadd.s32 1, %s1736_s13  ;;  %p1315_p0 = scmp.ge.s32.totalorder %s1740_s14, 1  ;;  %s1740_s14 = sphi %s1766_s14, %s14_s14   ;;  %s1736_s13 = sphi %s1764_s13, %s2065_s13   ;;  %s1732_s12 = sphi %s1762_s12, %s2064_s12  }
   0x3   : > { %p28_p1 = scmp.ge.s32.totalorder %s26_s15, 2  ;;  %p161_p2 = scmp.lt.s32.totalorder %s1740_s14, 3 }
   0x5   : > { %s2067_s15 = smov (%p28_p1, %s26_s15), 0  ;;  %p162_p3 = pnand %p1315_p0, %p161_p2 }
   0x6   : > { %p200_p4 = scmp.lt.s32.totalorder (!%p162_p3), %s1732_s12, 1 }
   0x7   : > { %165 = sbr.rel (%p162_p3) target bundleno = 482 (0x1e2), region = 28 }
   0xc   : > { %v1783_v0 = vld [vmem:[%s2061_s1] sm:$0xff]   ;;  %vm256_vm0 = vcmask 261120   ;;  %s2069_s12 = smov (!%p200_p4, %s1732_s12), 1  ;;  %v1705_v6 = vld [vmem:[%s2061_s1 + $0x8] sm:$0xff]   ;;  %vm1165_vm1 = vcmask 7168  }
   0xd   : > { %1616 = vmatprep.mubr.msk.bf16.mxu0 %vm256_vm0, %v1783_v0  ;;  %1624 = vmatprep.mubr.msk.bf16.mxu1 %vm256_vm0, %v1783_v0  ;;  %s1450_s18 = sshll.u32 %s2069_s12, 7  ;;  %s1452_s27 = sshll.u32 %s2069_s12, 6 }
   0xe   : > { %s1797_s21 = scalar_lea.vmem %s2060_s0, %s1450_s18  ;;  %s1843_s26 = scalar_lea.vmem %s2062_s2, %s1450_s18 }
   0xf   : > { %v1700_v1 = vld [vmem:[%s1797_s21 + $0x8] sm:$0xff]   ;;  %v1701_v2 = vld [vmem:[%s1797_s21 + $0x18] sm:$0xff]   ;;  %v1702_v3 = vld [vmem:[%s1797_s21] sm:$0xff]   ;;  %s2027_s30 = scalar_lea.vmem %s2063_s3, %s1452_s27 }
  0x10   : > { %1612 = vmatprep.subr.bf16.mxu0 %v1700_v1  ;;  %1620 = vmatprep.subr.bf16.mxu1 %v1701_v2  ;;  %v1703_v4 = vld [vmem:[%s1797_s21 + $0x10] sm:$0xff]   ;;  %v1706_v5 = vld [vmem:[%s1797_s21 + $0x28] sm:$0xff]   ;;  %v1708_v7 = vld [vmem:[%s1797_s21 + $0x38] sm:$0xff]  }
  0x11   : > { %1613 = vmatpush3.bf16.msra.mxu0 %v1700_v1  ;;  %1621 = vmatpush3.bf16.msra.mxu1 %v1701_v2  ;;  %v1707_v8 = vld [vmem:[%s1797_s21 + $0x20] sm:$0xff]   ;;  %v1709_v9 = vld [vmem:[%s1797_s21 + $0x30] sm:$0xff]   ;;  %v1710_v10 = vld [vmem:[%s1797_s21 + $0x48] sm:$0xff]  }
  0x12   : > { %1614 = vmatprep.subr.bf16.mxu0 %v1702_v3  ;;  %1622 = vmatprep.subr.bf16.mxu1 %v1703_v4  ;;  %v1712_v11 = vld [vmem:[%s1797_s21 + $0x58] sm:$0xff]   ;;  %v1711_v12 = vld [vmem:[%s1797_s21 + $0x40] sm:$0xff]   ;;  %v1713_v13 = vld [vmem:[%s1797_s21 + $0x50] sm:$0xff]  }
  0x13   : > { %v1714_v14 = vld [vmem:[%s1797_s21 + $0x68] sm:$0xff]   ;;  %v1716_v15 = vld [vmem:[%s1797_s21 + $0x78] sm:$0xff]   ;;  %v1715_v16 = vld [vmem:[%s1797_s21 + $0x60] sm:$0xff]  }
  0x14   : > { %v1717_v17 = vld [vmem:[%s1797_s21 + $0x70] sm:$0xff]  }
  0x15   : > { %1615 = vmatpush3.bf16.msra.mxu0 %v1702_v3  ;;  %1623 = vmatpush3.bf16.msra.mxu1 %v1703_v4 }
  0x16   : > { %1628 = vmatprep.subr.bf16.mxu0 %v1706_v5  ;;  %1636 = vmatprep.subr.bf16.mxu1 %v1708_v7 }
  0x18   : > { %1617 = vmatmul.mubr.msk.bf16.vlgmr.msra.gmra.mxu0 %vm256_vm0, %v1705_v6  ;;  %1625 = vmatmul.mubr.msk.bf16.vlgmr.msra.gmra.mxu1 %vm256_vm0, %v1705_v6 }
  0x19   : > { %1629 = vmatpush3.bf16.msra.mxu0 %v1706_v5  ;;  %1637 = vmatpush3.bf16.msra.mxu1 %v1708_v7 }
  0x1a   : > { %1630 = vmatprep.subr.bf16.mxu0 %v1707_v8  ;;  %1632 = vmatprep.mubr.msk.bf16.mxu0 %vm256_vm0, %v1783_v0 }
  0x1b   : > { %1638 = vmatprep.subr.bf16.mxu1 %v1709_v9  ;;  %1640 = vmatprep.mubr.msk.bf16.mxu1 %vm256_vm0, %v1783_v0 }
  0x1d   : > { %1631 = vmatpush3.bf16.msra.mxu0 %v1707_v8  ;;  %1639 = vmatpush3.bf16.msra.mxu1 %v1709_v9 }
  0x1e   : > { %1644 = vmatprep.subr.bf16.mxu0 %v1710_v10  ;;  %1652 = vmatprep.subr.bf16.mxu1 %v1712_v11 }
  0x20   : > { %1633 = vmatmul.mubr.msk.bf16.vlgmr.msra.gmra.mxu0 %vm256_vm0, %v1705_v6  ;;  %1641 = vmatmul.mubr.msk.bf16.vlgmr.msra.gmra.mxu1 %vm256_vm0, %v1705_v6 }
  0x21   : > { %1645 = vmatpush3.bf16.msra.mxu0 %v1710_v10  ;;  %1653 = vmatpush3.bf16.msra.mxu1 %v1712_v11 }
  0x22   : > { %1646 = vmatprep.subr.bf16.mxu0 %v1711_v12  ;;  %1648 = vmatprep.mubr.msk.bf16.mxu0 %vm256_vm0, %v1783_v0 }
  0x23   : > { %1654 = vmatprep.subr.bf16.mxu1 %v1713_v13  ;;  %1656 = vmatprep.mubr.msk.bf16.mxu1 %vm256_vm0, %v1783_v0 }
  0x25   : > { %1647 = vmatpush3.bf16.msra.mxu0 %v1711_v12  ;;  %1655 = vmatpush3.bf16.msra.mxu1 %v1713_v13 }
  0x26   : > { %1660 = vmatprep.subr.bf16.mxu0 %v1714_v14  ;;  %1668 = vmatprep.subr.bf16.mxu1 %v1716_v15 }
  0x28   : > { %1649 = vmatmul.mubr.msk.bf16.vlgmr.msra.gmra.mxu0 %vm256_vm0, %v1705_v6  ;;  %1657 = vmatmul.mubr.msk.bf16.vlgmr.msra.gmra.mxu1 %vm256_vm0, %v1705_v6 }
  0x29   : > { %1661 = vmatpush3.bf16.msra.mxu0 %v1714_v14  ;;  %1669 = vmatpush3.bf16.msra.mxu1 %v1716_v15 }
  0x2a   : > { %1662 = vmatprep.subr.bf16.mxu0 %v1715_v16  ;;  %1664 = vmatprep.mubr.msk.bf16.mxu0 %vm256_vm0, %v1783_v0 }
  0x2b   : > { %1670 = vmatprep.subr.bf16.mxu1 %v1717_v17  ;;  %1672 = vmatprep.mubr.msk.bf16.mxu1 %vm256_vm0, %v1783_v0 }
  0x2d   : > { %1663 = vmatpush3.bf16.msra.mxu0 %v1715_v16  ;;  %1671 = vmatpush3.bf16.msra.mxu1 %v1717_v17 }
  0x30   : > { %1665 = vmatmul.mubr.msk.bf16.vlgmr.msra.gmra.mxu0 %vm256_vm0, %v1705_v6  ;;  %1673 = vmatmul.mubr.msk.bf16.vlgmr.msra.gmra.mxu1 %vm256_vm0, %v1705_v6 }
  0xd8   : > { %v1618_v18 = vpop.f32.mrf.mxu0  ;;  %v1626_v19 = vpop.f32.mrf.mxu1 }
  0xd9   : > { %336 = vadd.xlane.f32.xlu1 %v1618_v18  ;;  %451 = vadd.xlane.f32.xlu0 %v1626_v19  ;;  %v346_v30 = vmul.f32 %v1618_v18, %v1618_v18  ;;  %v461_v43 = vmul.f32 %v1626_v19, %v1626_v19 }
  0xda   : > { %v297_v20 = vpop.f32.mrf.mxu0  ;;  %v411_v21 = vpop.f32.mrf.mxu1 }
  0xdb   : > { %v344_v50 = vmul.f32 %v297_v20, %v297_v20  ;;  %v459_v59 = vmul.f32 %v411_v21, %v411_v21 }
  0xdc   : > { %v1619_v22 = vpop.f32.mrf.mxu0  ;;  %v1627_v24 = vpop.f32.mrf.mxu1 }
  0xdd   : > { %v1493_v23 = vpack.c.bf16 %v1619_v22, %v1618_v18  ;;  %338 = vadd.xlane.f32.xlu1 %v1619_v22  ;;  %v1503_v25 = vpack.c.bf16 %v1627_v24, %v1626_v19  ;;  %332 = vadd.xlane.f32.xlu0 %v297_v20  ;;  %v347_v34 = vmul.f32 %v1619_v22, %v1619_v22 }
  0xde   : > { %v1845_v26 = vpop.f32.mrf.mxu0  ;;  %v414_v28 = vpop.f32.mrf.mxu1  ;;  %v462_v48 = vmul.f32 %v1627_v24, %v1627_v24 }
  0xdf   : > { %1565 = vst [vmem:[%s1843_s26 + $0x8] sm:$0xff] %v1493_v23   ;;  %v1488_v27 = vpack.c.bf16 %v1845_v26, %v297_v20  ;;  %1567 = vst [vmem:[%s1843_s26 + $0x18] sm:$0xff] %v1503_v25   ;;  %v1498_v29 = vpack.c.bf16 %v414_v28, %v411_v21  ;;  %v345_v56 = vmul.f32 %v1845_v26, %v1845_v26 }
  0xe0   : > { %v1850_v31 = vpop.f32.mrf.mxu0  ;;  %v1853_v32 = vpop.f32.mrf.mxu1  ;;  %v460_v0 = vmul.f32 %v414_v28, %v414_v28 }
  0xe1   : > { %1489 = vst [vmem:[%s1843_s26] sm:$0xff] %v1488_v27   ;;  %453 = vadd.xlane.f32.xlu1 %v1627_v24  ;;  %1566 = vst [vmem:[%s1843_s26 + $0x10] sm:$0xff] %v1498_v29   ;;  %352 = vadd.xlane.f32.xlu0 %v346_v30  ;;  %v576_v11 = vmul.f32 %v1850_v31, %v1850_v31  ;;  %v691_v13 = vmul.f32 %v1853_v32, %v1853_v32 }
  0xe2   : > { %v1856_v33 = vpop.f32.mrf.mxu0  ;;  %v1858_v35 = vpop.f32.mrf.mxu1 }
  0xe3   : > { %v574_v15 = vmul.f32 %v1856_v33, %v1856_v33  ;;  %v689_v17 = vmul.f32 %v1858_v35, %v1858_v35 }
  0xe4   : > { %v1860_v36 = vpop.f32.mrf.mxu0  ;;  %v1864_v38 = vpop.f32.mrf.mxu1 }
  0xe5   : > { %354 = vadd.xlane.f32.xlu1 %v347_v34  ;;  %v1513_v37 = vpack.c.bf16 %v1860_v36, %v1850_v31  ;;  %447 = vadd.xlane.f32.xlu0 %v411_v21  ;;  %v1523_v40 = vpack.c.bf16 %v1864_v38, %v1853_v32  ;;  %v577_v10 = vmul.f32 %v1860_v36, %v1860_v36 }
  0xe6   : > { %v1866_v39 = vpop.f32.mrf.mxu0  ;;  %v1873_v42 = vpop.f32.mrf.mxu1  ;;  %v692_v12 = vmul.f32 %v1864_v38, %v1864_v38 }
  0xe7   : > { %1569 = vst [vmem:[%s1843_s26 + $0x28] sm:$0xff] %v1513_v37   ;;  %v1508_v41 = vpack.c.bf16 %v1866_v39, %v1856_v33  ;;  %1571 = vst [vmem:[%s1843_s26 + $0x38] sm:$0xff] %v1523_v40   ;;  %v1518_v44 = vpack.c.bf16 %v1873_v42, %v1858_v35  ;;  %v575_v14 = vmul.f32 %v1866_v39, %v1866_v39 }
  0xe8   : > { %v1878_v45 = vpop.f32.mrf.mxu0  ;;  %v1881_v46 = vpop.f32.mrf.mxu1  ;;  %v690_v16 = vmul.f32 %v1873_v42, %v1873_v42 }
  0xe9   : > { %449 = vadd.xlane.f32.xlu1 %v414_v28  ;;  %1568 = vst [vmem:[%s1843_s26 + $0x20] sm:$0xff] %v1508_v41   ;;  %467 = vadd.xlane.f32.xlu0 %v461_v43  ;;  %1570 = vst [vmem:[%s1843_s26 + $0x30] sm:$0xff] %v1518_v44   ;;  %v806_v19 = vmul.f32 %v1878_v45, %v1878_v45  ;;  %v921_v21 = vmul.f32 %v1881_v46, %v1881_v46 }
  0xea   : > { %v1884_v47 = vpop.f32.mrf.mxu0  ;;  %v1886_v49 = vpop.f32.mrf.mxu1 }
  0xeb   : > { %v804_v23 = vmul.f32 %v1884_v47, %v1884_v47  ;;  %v919_v25 = vmul.f32 %v1886_v49, %v1886_v49 }
  0xec   : > { %v1888_v51 = vpop.f32.mrf.mxu0  ;;  %v1892_v53 = vpop.f32.mrf.mxu1 }
  0xed   : > { %469 = vadd.xlane.f32.xlu1 %v462_v48  ;;  %v1533_v52 = vpack.c.bf16 %v1888_v51, %v1878_v45  ;;  %348 = vadd.xlane.f32.xlu0 %v344_v50  ;;  %v1543_v55 = vpack.c.bf16 %v1892_v53, %v1881_v46  ;;  %v807_v18 = vmul.f32 %v1888_v51, %v1888_v51 }
  0xee   : > { %v1894_v54 = vpop.f32.mrf.mxu0  ;;  %v1903_v58 = vpop.f32.mrf.mxu1  ;;  %v922_v20 = vmul.f32 %v1892_v53, %v1892_v53 }
  0xef   : > { %1573 = vst [vmem:[%s1843_s26 + $0x48] sm:$0xff] %v1533_v52   ;;  %v1528_v57 = vpack.c.bf16 %v1894_v54, %v1884_v47  ;;  %1575 = vst [vmem:[%s1843_s26 + $0x58] sm:$0xff] %v1543_v55   ;;  %v1538_v60 = vpack.c.bf16 %v1903_v58, %v1886_v49  ;;  %v805_v22 = vmul.f32 %v1894_v54, %v1894_v54 }
  0xf0   : > { %v1908_v61 = vpop.f32.mrf.mxu0  ;;  %v1911_v62 = vpop.f32.mrf.mxu1  ;;  %v920_v24 = vmul.f32 %v1903_v58, %v1903_v58 }
  0xf1   : > { %350 = vadd.xlane.f32.xlu1 %v345_v56  ;;  %1572 = vst [vmem:[%s1843_s26 + $0x40] sm:$0xff] %v1528_v57   ;;  %463 = vadd.xlane.f32.xlu0 %v459_v59  ;;  %1574 = vst [vmem:[%s1843_s26 + $0x50] sm:$0xff] %v1538_v60   ;;  %v1036_v27 = vmul.f32 %v1908_v61, %v1908_v61 }
  0xf2   : > { %v1914_v63 = vpop.f32.mrf.mxu0  ;;  %v1916_v1 = vpop.f32.mrf.mxu1 }
  0xf3   : > { %v1034_v29 = vmul.f32 %v1914_v63, %v1914_v63 }
  0xf4   : > { %v1918_v2 = vpop.f32.mrf.mxu0  ;;  %v1922_v4 = vpop.f32.mrf.mxu1 }
  0xf5   : > { %465 = vadd.xlane.f32.xlu1 %v460_v0  ;;  %v1553_v3 = vpack.c.bf16 %v1918_v2, %v1908_v61  ;;  %334 = vadd.xlane.f32.xlu0 %v1845_v26  ;;  %v1563_v6 = vpack.c.bf16 %v1922_v4, %v1911_v62  ;;  %v1037_v26 = vmul.f32 %v1918_v2, %v1918_v2 }
  0xf6   : > { %v1925_v5 = vpop.f32.mrf.mxu0  ;;  %v1932_v8 = vpop.f32.mrf.mxu1 }
  0xf7   : > { %1577 = vst [vmem:[%s1843_s26 + $0x68] sm:$0xff] %v1553_v3   ;;  %v1548_v7 = vpack.c.bf16 %v1925_v5, %v1914_v63  ;;  %1579 = vst [vmem:[%s1843_s26 + $0x78] sm:$0xff] %v1563_v6   ;;  %v1558_v9 = vpack.c.bf16 %v1932_v8, %v1916_v1  ;;  %v1035_v28 = vmul.f32 %v1925_v5, %v1925_v5 }
  0xf8   : > { %v1150_v30 = vmul.f32 %v1932_v8, %v1932_v8 }
  0xf9   : > { %568 = vadd.xlane.f32.xlu1 %v1860_v36  ;;  %1576 = vst [vmem:[%s1843_s26 + $0x60] sm:$0xff] %v1548_v7   ;;  %566 = vadd.xlane.f32.xlu0 %v1850_v31  ;;  %1578 = vst [vmem:[%s1843_s26 + $0x70] sm:$0xff] %v1558_v9   ;;  %v1149_v31 = vmul.f32 %v1916_v1, %v1916_v1 }
  0xfd   : > { %683 = vadd.xlane.f32.xlu1 %v1864_v38  ;;  %681 = vadd.xlane.f32.xlu0 %v1853_v32  ;;  %v1152_v32 = vmul.f32 %v1922_v4, %v1922_v4 }
 0x101   : > { %564 = vadd.xlane.f32.xlu1 %v1866_v39  ;;  %562 = vadd.xlane.f32.xlu0 %v1856_v33  ;;  %v1151_v33 = vmul.f32 %v1911_v62, %v1911_v62 }
 0x105   : > { %584 = vadd.xlane.f32.xlu1 %v577_v10  ;;  %582 = vadd.xlane.f32.xlu0 %v576_v11 }
 0x109   : > { %679 = vadd.xlane.f32.xlu1 %v1873_v42  ;;  %677 = vadd.xlane.f32.xlu0 %v1858_v35 }
 0x10d   : > { %699 = vadd.xlane.f32.xlu1 %v692_v12  ;;  %697 = vadd.xlane.f32.xlu0 %v691_v13 }
 0x111   : > { %580 = vadd.xlane.f32.xlu1 %v575_v14  ;;  %578 = vadd.xlane.f32.xlu0 %v574_v15 }
 0x115   : > { %695 = vadd.xlane.f32.xlu1 %v690_v16  ;;  %693 = vadd.xlane.f32.xlu0 %v689_v17 }
 0x119   : > { %798 = vadd.xlane.f32.xlu1 %v1888_v51  ;;  %796 = vadd.xlane.f32.xlu0 %v1878_v45 }
 0x11d   : > { %913 = vadd.xlane.f32.xlu1 %v1892_v53  ;;  %911 = vadd.xlane.f32.xlu0 %v1881_v46 }
 0x121   : > { %794 = vadd.xlane.f32.xlu1 %v1894_v54  ;;  %792 = vadd.xlane.f32.xlu0 %v1884_v47 }
 0x125   : > { %814 = vadd.xlane.f32.xlu1 %v807_v18  ;;  %812 = vadd.xlane.f32.xlu0 %v806_v19 }
 0x129   : > { %909 = vadd.xlane.f32.xlu1 %v1903_v58  ;;  %907 = vadd.xlane.f32.xlu0 %v1886_v49 }
 0x12d   : > { %929 = vadd.xlane.f32.xlu1 %v922_v20  ;;  %927 = vadd.xlane.f32.xlu0 %v921_v21 }
 0x131   : > { %810 = vadd.xlane.f32.xlu1 %v805_v22  ;;  %808 = vadd.xlane.f32.xlu0 %v804_v23 }
 0x135   : > { %925 = vadd.xlane.f32.xlu1 %v920_v24  ;;  %923 = vadd.xlane.f32.xlu0 %v919_v25 }
 0x139   : > { %1028 = vadd.xlane.f32.xlu1 %v1918_v2  ;;  %1026 = vadd.xlane.f32.xlu0 %v1908_v61 }
 0x13d   : > { %1143 = vadd.xlane.f32.xlu1 %v1922_v4  ;;  %1141 = vadd.xlane.f32.xlu0 %v1911_v62 }
 0x141   : > { %1024 = vadd.xlane.f32.xlu1 %v1925_v5  ;;  %1022 = vadd.xlane.f32.xlu0 %v1914_v63 }
 0x145   : > { %1044 = vadd.xlane.f32.xlu1 %v1037_v26  ;;  %1042 = vadd.xlane.f32.xlu0 %v1036_v27 }
 0x149   : > { %1139 = vadd.xlane.f32.xlu1 %v1932_v8  ;;  %1137 = vadd.xlane.f32.xlu0 %v1916_v1 }
 0x14d   : > { %1040 = vadd.xlane.f32.xlu1 %v1035_v28  ;;  %1038 = vadd.xlane.f32.xlu0 %v1034_v29 }
 0x151   : > { %1155 = vadd.xlane.f32.xlu1 %v1150_v30  ;;  %1153 = vadd.xlane.f32.xlu0 %v1149_v31 }
 0x155   : > { %1159 = vadd.xlane.f32.xlu1 %v1152_v32  ;;  %1157 = vadd.xlane.f32.xlu0 %v1151_v33 }
 0x162   : > { %v337_v34 = vpop.xlane.xlu1 %336  ;;  %v452_v35 = vpop.xlane.xlu0 %451 }
 0x163   : > { %v457_v36 = vadd.f32 %v452_v35, %v337_v34 }
 0x166   : > { %v339_v37 = vpop.xlane.xlu1 %338  ;;  %v333_v38 = vpop.xlane.xlu0 %332 }
 0x16a   : > { %v454_v39 = vpop.xlane.xlu1 %453  ;;  %v353_v40 = vpop.xlane.xlu0 %352 }
 0x16b   : > { %v458_v41 = vadd.f32 %v454_v39, %v339_v37 }
 0x16e   : > { %v355_v42 = vpop.xlane.xlu1 %354  ;;  %v448_v43 = vpop.xlane.xlu0 %447 }
 0x16f   : > { %v2011_v44 = vadd.f32 %v448_v43, %v333_v38 }
 0x172   : > { %v450_v45 = vpop.xlane.xlu1 %449  ;;  %v468_v46 = vpop.xlane.xlu0 %467 }
 0x173   : > { %v473_v47 = vadd.f32 %v468_v46, %v353_v40 }
 0x176   : > { %v470_v48 = vpop.xlane.xlu1 %469  ;;  %v349_v49 = vpop.xlane.xlu0 %348 }
 0x177   : > { %v474_v50 = vadd.f32 %v470_v48, %v355_v42 }
 0x17a   : > { %v351_v51 = vpop.xlane.xlu1 %350  ;;  %v464_v52 = vpop.xlane.xlu0 %463 }
 0x17b   : > { %v2013_v53 = vadd.f32 %v464_v52, %v349_v49 }
 0x17e   : > { %v466_v54 = vpop.xlane.xlu1 %465  ;;  %v335_v55 = vpop.xlane.xlu0 %334 }
 0x17f   : > { %v2015_v56 = vadd.f32 %v466_v54, %v351_v51  ;;  %v456_v57 = vadd.f32 %v450_v45, %v335_v55 }
 0x182   : > { %v569_v58 = vpop.xlane.xlu1 %568  ;;  %v567_v59 = vpop.xlane.xlu0 %566 }
 0x183   : > { %v573_v28 = vadd.f32 %v569_v58, %v458_v41  ;;  %v572_v29 = vadd.f32 %v567_v59, %v457_v36 }
 0x186   : > { %v684_v60 = vpop.xlane.xlu1 %683  ;;  %v682_v61 = vpop.xlane.xlu0 %681 }
 0x187   : > { %v688_v31 = vadd.f32 %v684_v60, %v573_v28  ;;  %v687_v33 = vadd.f32 %v682_v61, %v572_v29 }
 0x18a   : > { %v565_v62 = vpop.xlane.xlu1 %564  ;;  %v563_v63 = vpop.xlane.xlu0 %562 }
 0x18b   : > { %v570_v48 = vadd.f32 %v563_v63, %v2011_v44 }
 0x18e   : > { %v585_v0 = vpop.xlane.xlu1 %584  ;;  %v583_v1 = vpop.xlane.xlu0 %582 }
 0x18f   : > { %v589_v2 = vadd.f32 %v585_v0, %v474_v50  ;;  %v588_v3 = vadd.f32 %v583_v1, %v473_v47  ;;  %v571_v47 = vadd.f32 %v565_v62, %v456_v57 }
 0x192   : > { %v680_v4 = vpop.xlane.xlu1 %679  ;;  %v678_v5 = vpop.xlane.xlu0 %677 }
 0x193   : > { %v686_v50 = vadd.f32 %v680_v4, %v571_v47  ;;  %v685_v52 = vadd.f32 %v678_v5, %v570_v48 }
 0x196   : > { %v700_v6 = vpop.xlane.xlu1 %699  ;;  %v698_v7 = vpop.xlane.xlu0 %697 }
 0x197   : > { %v2017_v8 = vadd.f32 %v700_v6, %v589_v2  ;;  %v2019_v9 = vadd.f32 %v698_v7, %v588_v3 }
 0x19a   : > { %v581_v10 = vpop.xlane.xlu1 %580  ;;  %v579_v11 = vpop.xlane.xlu0 %578 }
 0x19b   : > { %v587_v57 = vadd.f32 %v581_v10, %v2015_v56  ;;  %v586_v0 = vadd.f32 %v579_v11, %v2013_v53 }
 0x19e   : > { %v696_v12 = vpop.xlane.xlu1 %695  ;;  %v694_v13 = vpop.xlane.xlu0 %693 }
 0x19f   : > { %v702_v1 = vadd.f32 %v696_v12, %v587_v57  ;;  %v701_v4 = vadd.f32 %v694_v13, %v586_v0 }
 0x1a2   : > { %v799_v14 = vpop.xlane.xlu1 %798  ;;  %v797_v15 = vpop.xlane.xlu0 %796 }
 0x1a3   : > { %v803_v34 = vadd.f32 %v799_v14, %v688_v31  ;;  %v802_v35 = vadd.f32 %v797_v15, %v687_v33 }
 0x1a6   : > { %v914_v16 = vpop.xlane.xlu1 %913  ;;  %v912_v17 = vpop.xlane.xlu0 %911 }
 0x1a7   : > { %v918_v38 = vadd.f32 %v914_v16, %v803_v34  ;;  %v917_v40 = vadd.f32 %v912_v17, %v802_v35 }
 0x1aa   : > { %v795_v18 = vpop.xlane.xlu1 %794  ;;  %v793_v19 = vpop.xlane.xlu0 %792 }
 0x1ab   : > { %v801_v54 = vadd.f32 %v795_v18, %v686_v50  ;;  %v800_v55 = vadd.f32 %v793_v19, %v685_v52 }
 0x1ae   : > { %v815_v20 = vpop.xlane.xlu1 %814  ;;  %v813_v21 = vpop.xlane.xlu0 %812 }
 0x1af   : > { %v819_v53 = vadd.f32 %v815_v20, %v2017_v8  ;;  %v818_v12 = vadd.f32 %v813_v21, %v2019_v9 }
 0x1b2   : > { %v910_v22 = vpop.xlane.xlu1 %909  ;;  %v908_v23 = vpop.xlane.xlu0 %907 }
 0x1b3   : > { %v916_v59 = vadd.f32 %v910_v22, %v801_v54  ;;  %v915_v61 = vadd.f32 %v908_v23, %v800_v55 }
 0x1b6   : > { %v930_v24 = vpop.xlane.xlu1 %929  ;;  %v2021_v25 = vpop.xlane.xlu0 %927 }
 0x1b7   : > { %v934_v17 = vadd.f32 %v930_v24, %v819_v53  ;;  %v933_v22 = vadd.f32 %v2021_v25, %v818_v12 }
 0x1ba   : > { %v811_v26 = vpop.xlane.xlu1 %810  ;;  %v809_v27 = vpop.xlane.xlu0 %808 }
 0x1bb   : > { %v817_v6 = vadd.f32 %v811_v26, %v702_v1  ;;  %v816_v7 = vadd.f32 %v809_v27, %v701_v4 }
 0x1be   : > { %v926_v30 = vpop.xlane.xlu1 %925  ;;  %v924_v32 = vpop.xlane.xlu0 %923 }
 0x1bf   : > { %v932_v15 = vadd.f32 %v926_v30, %v817_v6  ;;  %v931_v10 = vadd.f32 %v924_v32, %v816_v7 }
 0x1c2   : > { %v1029_v37 = vpop.xlane.xlu1 %1028  ;;  %v1027_v39 = vpop.xlane.xlu0 %1026 }
 0x1c3   : > { %v1033_v42 = vadd.f32 %v1029_v37, %v918_v38  ;;  %v1032_v43 = vadd.f32 %v1027_v39, %v917_v40 }
 0x1c6   : > { %v1144_v36 = vpop.xlane.xlu1 %1143  ;;  %v1142_v41 = vpop.xlane.xlu0 %1141 }
 0x1c7   : > { %v1148_v45 = vadd.f32 %v1144_v36, %v1033_v42  ;;  %v1147_v46 = vadd.f32 %v1142_v41, %v1032_v43 }
 0x1c9   : > { %1169 = vst.msk [vmem:[%s2027_s30 + $0x18] sm:$0xff] %vm1165_vm1, %v1148_v45  ;;  %1168 = vst.msk [vmem:[%s2027_s30 + $0x10] sm:$0xff] %vm1165_vm1, %v1147_v46 }
 0x1ca   : > { %v1025_v49 = vpop.xlane.xlu1 %1024  ;;  %v1023_v51 = vpop.xlane.xlu0 %1022 }
 0x1cb   : > { %v1031_v62 = vadd.f32 %v1025_v49, %v916_v59  ;;  %v1030_v44 = vadd.f32 %v1023_v51, %v915_v61 }
 0x1ce   : > { %v1045_v58 = vpop.xlane.xlu1 %1044  ;;  %v1043_v60 = vpop.xlane.xlu0 %1042 }
 0x1cf   : > { %v1049_v26 = vadd.f32 %v1045_v58, %v934_v17  ;;  %v1048_v27 = vadd.f32 %v1043_v60, %v933_v22 }
 0x1d2   : > { %v1140_v63 = vpop.xlane.xlu1 %1139  ;;  %v1138_v2 = vpop.xlane.xlu0 %1137 }
 0x1d3   : > { %v1146_v3 = vadd.f32 %v1140_v63, %v1031_v62  ;;  %v1145_v5 = vadd.f32 %v1138_v2, %v1030_v44 }
 0x1d5   : > { %1167 = vst.msk [vmem:[%s2027_s30 + $0x8] sm:$0xff] %vm1165_vm1, %v1146_v3  ;;  %1166 = vst.msk [vmem:[%s2027_s30] sm:$0xff] %vm1165_vm1, %v1145_v5 }
 0x1d6   : > { %v1041_v14 = vpop.xlane.xlu1 %1040  ;;  %v1039_v56 = vpop.xlane.xlu0 %1038 }
 0x1d7   : > { %v1047_v11 = vadd.f32 %v1041_v14, %v932_v15  ;;  %v1046_v13 = vadd.f32 %v1039_v56, %v931_v10 }
 0x1da   : > { %v1156_v16 = vpop.xlane.xlu1 %1155  ;;  %v1154_v18 = vpop.xlane.xlu0 %1153 }
 0x1db   : > { %v1162_v19 = vadd.f32 %v1156_v16, %v1047_v11  ;;  %v1161_v23 = vadd.f32 %v1154_v18, %v1046_v13 }
 0x1dd   : > { %1445 = vst.msk [vmem:[%s2027_s30 + $0x28] sm:$0xff] %vm1165_vm1, %v1162_v19  ;;  %1444 = vst.msk [vmem:[%s2027_s30 + $0x20] sm:$0xff] %vm1165_vm1, %v1161_v23 }
 0x1de   : > { %v1160_v8 = vpop.xlane.xlu1 %1159  ;;  %v1158_v20 = vpop.xlane.xlu0 %1157 }
 0x1df   : > { %v1164_v28 = vadd.f32 %v1160_v8, %v1049_v26  ;;  %v1163_v9 = vadd.f32 %v1158_v20, %v1048_v27 }
 0x1e1   : > { %1447 = vst.msk [vmem:[%s2027_s30 + $0x38] sm:$0xff] %vm1165_vm1, %v1164_v28  ;;  %1446 = vst.msk [vmem:[%s2027_s30 + $0x30] sm:$0xff] %vm1165_vm1, %v1163_v9 }
 0x1e2 PF: > { %s14_s14 = sadd.s32 1, %s1740_s14   ;;  %s2064_s12 = smov %s1736_s13 }
 0x1e3   : > { %p11_p5 = scmp.ge.s32.totalorder %s14_s14, 4   ;;  %s2065_s13 = smov %s2067_s15 }
 0x1e5   :  { %13 = sbr.rel (!%p11_p5) target bundleno = 2 (0x2), region = 85 }

// kernel: local_feature_forward.3
= control target key start
LH: loop header
LB: loop body
LE: loop exit
PB: predicated region body
PF: predicated region fallthrough
CT: control target
= control target key end

     0   :  { %s2366_s18 = smov 0   ;;  %s2368_s19 = smov 0   ;;  %s3332_s0 = inlined_call_operand.vmem [shape: bf16[2,8,32,128], index: 0, kind: input, shape index: {}]   ;;  %s3333_s1 = inlined_call_operand.vmem [shape: f32[2,32,1], index: 1, kind: input, shape index: {}]   ;;  %s3334_s2 = inlined_call_operand.vmem [shape: f32[2,32,1], index: 2, kind: input, shape index: {}]   ;;  %s3335_s3 = inlined_call_operand.vmem [shape: bf16[64,32], index: 3, kind: input, shape index: {}]   ;;  %s3336_s4 = inlined_call_operand.vmem [shape: f32[2,2,64,128], index: 4, kind: output, shape index: {0}]   ;;  %s3337_s5 = inlined_call_operand.vmem [shape: f32[2,1,2,64,1], index: 5, kind: output, shape index: {1}]  }
   0x1   :  { %s2370_s20 = smov 0  }
   0x2 LB: > { %s28_s21 = sadd.s32 1, %s2329_s19  ;;  %p1911_p0 = scmp.ge.s32.totalorder %s2333_s20, 1  ;;  %s2333_s20 = sphi %s2370_s20, %s16_s20   ;;  %s2329_s19 = sphi %s2368_s19, %s3353_s19   ;;  %s2325_s18 = sphi %s2366_s18, %s3352_s18  }
   0x3   : > { %p30_p1 = scmp.ge.s32.totalorder %s28_s21, 2  ;;  %p231_p2 = scmp.lt.s32.totalorder %s2333_s20, 3 }
   0x5   : > { %s3355_s21 = smov (%p30_p1, %s28_s21), 0  ;;  %p232_p3 = pnand %p1911_p0, %p231_p2 }
   0x7   : > { %235 = sbr.rel (%p232_p3) target bundleno = 756 (0x2f4), region = 36 }
   0xc   : > { %p284_p4 = scmp.lt.s32.totalorder %s2325_s18, 1  ;;  %v2335_v0 = vmov 0   ;;  %v2393_v9 = vld [vmem:[%s3335_s3] sm:$0xff]   ;;  %vm430_vm0 = vcmask 261120   ;;  %v336_v17 = vlaneseq  ;;  %vm1729_vm3 = vcmask 7168  }
   0xd   : > { %2306 = vset.pattern.permute.xlu1 %v2335_v0  ;;  %2305 = vset.pattern.permute.xlu0 %v2335_v0 }
   0xe   : > { %s3357_s18 = smov (!%p284_p4, %s2325_s18), 1  ;;  %2188 = vmatprep.mubr.msk.bf16.mxu0 %vm430_vm0, %v2393_v9  ;;  %2200 = vmatprep.mubr.msk.bf16.mxu1 %vm430_vm0, %v2393_v9  ;;  %v337_v33 = vand.u32 127, %v336_v17 }
   0xf   : > { %s2053_s22 = sshll.u32 %s3357_s18, 5  ;;  %s2399_s6 = sshll.u32 %s3357_s18, 7 }
  0x10   : > { %s301_s25 = scalar_lea.vmem %s3334_s2, %s2053_s22  ;;  %s296_s28 = scalar_lea.vmem %s3333_s1, %s2053_s22  ;;  %vm341_vm1 = vcmp.lt.s32.totalorder %v337_v33, 16 }
  0x11   : > { %v334_v1 = vld [vmem:[%s301_s25 + $0x10] sm:$0xff]  ;;  %v335_v3 = vld [vmem:[%s301_s25 + $0x18] sm:$0xff]  ;;  %v329_v5 = vld [vmem:[%s296_s28 + $0x8] sm:$0xff]  ;;  %s2405_s9 = scalar_lea.vmem %s3332_s0, %s2399_s6  ;;  %s2902_s18 = scalar_lea.vmem %s3336_s4, %s2399_s6 }
  0x12   : > { %386 = vperm.xlu1 %2306, %v334_v1   ;;  %v330_v2 = vld [vmem:[%s296_s28 + $0x10] sm:$0xff]  ;;  %v331_v4 = vld [vmem:[%s296_s28 + $0x18] sm:$0xff]  ;;  %v328_v6 = vld [vmem:[%s296_s28] sm:$0xff]  ;;  %s3263_s24 = scalar_lea.vmem %s3337_s5, %s2399_s6 }
  0x13   : > { %362 = vperm.xlu0 %2305, %v330_v2   ;;  %v333_v7 = vld [vmem:[%s301_s25 + $0x8] sm:$0xff]  ;;  %v332_v8 = vld [vmem:[%s301_s25] sm:$0xff]  ;;  %v2123_v11 = vld [vmem:[%s2405_s9 + $0x18] sm:$0xff]  }
  0x14   : > { %v2121_v10 = vld [vmem:[%s2405_s9 + $0x8] sm:$0xff]   ;;  %v2071_v14 = vunpack.c.l.bf16 %v2123_v11  ;;  %v2127_v15 = vld [vmem:[%s2405_s9 + $0x38] sm:$0xff]   ;;  %v2058_v18 = vld [vmem:[%s2405_s9] sm:$0xff]   ;;  %v2072_v23 = vunpack.c.h.bf16 %v2123_v11 }
  0x15   : > { %v2125_v12 = vld [vmem:[%s2405_s9 + $0x28] sm:$0xff]   ;;  %v2063_v13 = vunpack.c.l.bf16 %v2121_v10  ;;  %v2122_v19 = vld [vmem:[%s2405_s9 + $0x10] sm:$0xff]   ;;  %v2064_v22 = vunpack.c.h.bf16 %v2121_v10  ;;  %v2087_v25 = vunpack.c.l.bf16 %v2127_v15  ;;  %v2124_v26 = vld [vmem:[%s2405_s9 + $0x20] sm:$0xff]   ;;  %v2059_v30 = vunpack.c.l.bf16 %v2058_v18 }
  0x16   : > { %391 = vperm.xlu1 %2306, %v335_v3   ;;  %v2079_v20 = vunpack.c.l.bf16 %v2125_v12  ;;  %v2080_v24 = vunpack.c.h.bf16 %v2125_v12  ;;  %v2126_v27 = vld [vmem:[%s2405_s9 + $0x30] sm:$0xff]   ;;  %v2088_v31 = vunpack.c.h.bf16 %v2127_v15  ;;  %v2060_v34 = vunpack.c.h.bf16 %v2058_v18  ;;  %v2424_v37 = vld [vmem:[%s2405_s9 + $0x48] sm:$0xff]   ;;  %v2428_v42 = vld [vmem:[%s2405_s9 + $0x58] sm:$0xff]  }
  0x17   : > { %367 = vperm.xlu0 %2305, %v331_v4   ;;  %v2067_v35 = vunpack.c.l.bf16 %v2122_v19  ;;  %v2068_v36 = vunpack.c.h.bf16 %v2122_v19  ;;  %v2075_v39 = vunpack.c.l.bf16 %v2124_v26  ;;  %v2076_v40 = vunpack.c.h.bf16 %v2124_v26  ;;  %vm2458_vm2 = vmpackc.low %vm341_vm1, %vm341_vm1 }
  0x18   : > { %v2083_v41 = vunpack.c.l.bf16 %v2126_v27  ;;  %v2084_v47 = vunpack.c.h.bf16 %v2126_v27  ;;  %v2095_v50 = vunpack.c.l.bf16 %v2424_v37  ;;  %v2096_v51 = vunpack.c.h.bf16 %v2424_v37 }
  0x19   : > { %v2103_v55 = vunpack.c.l.bf16 %v2428_v42  ;;  %v2104_v59 = vunpack.c.h.bf16 %v2428_v42 }
  0x1a   : > { %357 = vperm.xlu1 %2306, %v329_v5  }
  0x1b   : > { %352 = vperm.xlu0 %2305, %v328_v6  }
  0x1e   : > { %381 = vperm.xlu1 %2306, %v333_v7  }
  0x1f   : > { %376 = vperm.xlu0 %2305, %v332_v8  }
  0x8d   : > { %v2411_v16 = vpop.permute.xlu1 %386 }
  0x8e   : > { %v2415_v21 = vpop.permute.xlu0 %362 }
  0x8f   : > { %v372_v28 = vmul.f32 %v2063_v13, %v2415_v21  ;;  %v575_v29 = vmul.f32 %v2071_v14, %v2415_v21  ;;  %v739_v38 = vmul.f32 %v2079_v20, %v2415_v21  ;;  %v903_v46 = vmul.f32 %v2087_v25, %v2415_v21 }
  0x90   : > { %v1231_v42 = vmul.f32 %v2103_v55, %v2415_v21 }
  0x91   : > { %v2421_v32 = vpop.permute.xlu1 %391  ;;  %v396_v44 = vadd.f32 %v2411_v16, %v372_v28  ;;  %v579_v45 = vadd.f32 %v575_v29, %v2411_v16  ;;  %v743_v58 = vadd.f32 %v739_v38, %v2411_v16  ;;  %v907_v0 = vadd.f32 %v903_v46, %v2411_v16 }
  0x92   : > { %v2430_v43 = vpop.permute.xlu0 %367  ;;  %v1235_v55 = vadd.f32 %v1231_v42, %v2411_v16  ;;  %v2134_v42 = vld [vmem:[%s2405_s9 + $0x70] sm:$0xff]  }
  0x93   : > { %v373_v48 = vmul.f32 %v2064_v22, %v2430_v43  ;;  %v576_v49 = vmul.f32 %v2072_v23, %v2430_v43  ;;  %v740_v53 = vmul.f32 %v2080_v24, %v2430_v43  ;;  %v904_v54 = vmul.f32 %v2088_v31, %v2430_v43 }
  0x94   : > { %v400_v61 = vmax.f32 %v396_v44, 0.0  ;;  %v583_v62 = vmax.f32 %v579_v45, 0.0  ;;  %v911_v37 = vmax.f32 %v907_v0, 0.0  ;;  %v1232_v38 = vmul.f32 %v2104_v59, %v2430_v43 }
  0x95   : > { %v2439_v52 = vpop.permute.xlu1 %357  ;;  %v397_v56 = vadd.f32 %v2421_v32, %v373_v48  ;;  %v580_v57 = vadd.f32 %v576_v49, %v2421_v32  ;;  %v744_v63 = vadd.f32 %v740_v53, %v2421_v32  ;;  %v908_v10 = vadd.f32 %v904_v54, %v2421_v32  ;;  %v2498_v48 = vld [vmem:[%s3335_s3 + $0x8] sm:$0xff]  }
  0x96   : > { %v2448_v60 = vpop.permute.xlu0 %352  ;;  %v371_v3 = vmul.f32 %v2060_v34, %v2439_v52  ;;  %v574_v4 = vmul.f32 %v2068_v36, %v2439_v52  ;;  %v738_v11 = vmul.f32 %v2076_v40, %v2439_v52  ;;  %v902_v22 = vmul.f32 %v2084_v47, %v2439_v52 }
  0x97   : > { %v401_v1 = vmax.f32 %v397_v56, 0.0  ;;  %v584_v2 = vmax.f32 %v580_v57, 0.0  ;;  %v370_v7 = vmul.f32 %v2059_v30, %v2448_v60  ;;  %v573_v8 = vmul.f32 %v2067_v35, %v2448_v60  ;;  %v2128_v56 = vld [vmem:[%s2405_s9 + $0x40] sm:$0xff]   ;;  %v2516_v57 = vld [vmem:[%s3335_s3 + $0x10] sm:$0xff]  }
  0x98   : > { %v748_v18 = vmax.f32 %v744_v63, 0.0  ;;  %v737_v19 = vmul.f32 %v2075_v39, %v2448_v60  ;;  %v901_v20 = vmul.f32 %v2083_v41, %v2448_v60  ;;  %v912_v27 = vmax.f32 %v908_v10, 0.0 }
  0x99   : > { %v2454_v5 = vpop.permute.xlu1 %381  ;;  %v1927_v12 = vpack.c.bf16 %v401_v1, %v400_v61  ;;  %v1941_v13 = vpack.c.bf16 %v584_v2, %v583_v62  ;;  %v1068_v35 = vmul.f32 %v2096_v51, %v2430_v43  ;;  %v747_v36 = vmax.f32 %v743_v58, 0.0  ;;  %v2130_v58 = vld [vmem:[%s2405_s9 + $0x50] sm:$0xff]  }
  0x9a   : > { %v395_v14 = vadd.f32 %v2454_v5, %v371_v3  ;;  %v578_v15 = vadd.f32 %v574_v4, %v2454_v5  ;;  %v2468_v17 = vpop.permute.xlu0 %376  ;;  %v742_v29 = vadd.f32 %v738_v11, %v2454_v5  ;;  %v906_v30 = vadd.f32 %v902_v22, %v2454_v5  ;;  %v2135_v11 = vld [vmem:[%s2405_s9 + $0x78] sm:$0xff]  }
  0x9b   : > { %2184 = vmatprep.subr.msk.bf16.mxu0 %vm2458_vm2, %v1927_v12  ;;  %2196 = vmatprep.subr.msk.bf16.mxu1 %vm2458_vm2, %v1941_v13  ;;  %v394_v23 = vadd.f32 %v2468_v17, %v370_v7  ;;  %v577_v25 = vadd.f32 %v573_v8, %v2468_v17  ;;  %v741_v28 = vadd.f32 %v737_v19, %v2468_v17  ;;  %v2091_v0 = vunpack.c.l.bf16 %v2128_v56  ;;  %v2133_v8 = vld [vmem:[%s2405_s9 + $0x68] sm:$0xff]  }
  0x9c   : > { %v399_v24 = vmax.f32 %v395_v14, 0.0  ;;  %v582_v26 = vmax.f32 %v578_v15, 0.0  ;;  %2185 = vmatpush3.bf16.msk.msra.mxu0 %vm2458_vm2, %v1927_v12  ;;  %2197 = vmatpush3.bf16.msk.msra.mxu1 %vm2458_vm2, %v1941_v13  ;;  %v905_v34 = vadd.f32 %v901_v20, %v2468_v17  ;;  %v1067_v41 = vmul.f32 %v2095_v50, %v2415_v21  ;;  %v2540_v14 = vld [vmem:[%s3335_s3 + $0x18] sm:$0xff]  }
  0x9d   : > { %v398_v31 = vmax.f32 %v394_v23, 0.0  ;;  %v581_v33 = vmax.f32 %v577_v25, 0.0  ;;  %v1955_v44 = vpack.c.bf16 %v748_v18, %v747_v36  ;;  %v1969_v45 = vpack.c.bf16 %v912_v27, %v911_v37 }
  0x9e   : > { %v746_v46 = vmax.f32 %v742_v29, 0.0  ;;  %v910_v47 = vmax.f32 %v906_v30, 0.0  ;;  %v745_v49 = vmax.f32 %v741_v28, 0.0  ;;  %v909_v50 = vmax.f32 %v905_v34, 0.0 }
  0x9f   : > { %v1930_v39 = vpack.c.bf16 %v399_v24, %v398_v31  ;;  %v1944_v40 = vpack.c.bf16 %v582_v26, %v581_v33  ;;  %v1072_v51 = vadd.f32 %v1068_v35, %v2421_v32  ;;  %v1236_v53 = vadd.f32 %v1232_v38, %v2421_v32 }
  0xa0   : > { %v1071_v54 = vadd.f32 %v1067_v41, %v2411_v16  ;;  %v1958_v59 = vpack.c.bf16 %v746_v46, %v745_v49  ;;  %v1972_v61 = vpack.c.bf16 %v910_v47, %v909_v50  ;;  %v2092_v1 = vunpack.c.h.bf16 %v2128_v56  ;;  %v2132_v41 = vld [vmem:[%s2405_s9 + $0x60] sm:$0xff]  }
  0xa1   : > { %2186 = vmatprep.subr.msk.bf16.mxu0 %vm2458_vm2, %v1930_v39  ;;  %2198 = vmatprep.subr.msk.bf16.mxu1 %vm2458_vm2, %v1944_v40  ;;  %v1076_v62 = vmax.f32 %v1072_v51, 0.0  ;;  %v1240_v63 = vmax.f32 %v1236_v53, 0.0  ;;  %v1239_v3 = vmax.f32 %v1235_v55, 0.0  ;;  %v2099_v4 = vunpack.c.l.bf16 %v2130_v58 }
  0xa2   : > { %2187 = vmatpush3.bf16.msk.msra.mxu0 %vm2458_vm2, %v1930_v39  ;;  %2199 = vmatpush3.bf16.msk.msra.mxu1 %vm2458_vm2, %v1944_v40  ;;  %v1075_v2 = vmax.f32 %v1071_v54, 0.0  ;;  %v2100_v7 = vunpack.c.h.bf16 %v2130_v58  ;;  %v2112_v10 = vunpack.c.h.bf16 %v2133_v8  ;;  %v2120_v15 = vunpack.c.h.bf16 %v2135_v11 }
  0xa3   : > { %2208 = vmatprep.subr.msk.bf16.mxu0 %vm2458_vm2, %v1955_v44  ;;  %2220 = vmatprep.subr.msk.bf16.mxu1 %vm2458_vm2, %v1969_v45  ;;  %v1997_v13 = vpack.c.bf16 %v1240_v63, %v1239_v3  ;;  %v1065_v18 = vmul.f32 %v2091_v0, %v2448_v60  ;;  %v1066_v19 = vmul.f32 %v2092_v1, %v2439_v52  ;;  %v2111_v23 = vunpack.c.l.bf16 %v2133_v8 }
  0xa4   : > { %v1983_v12 = vpack.c.bf16 %v1076_v62, %v1075_v2  ;;  %v1229_v20 = vmul.f32 %v2099_v4, %v2448_v60  ;;  %v1230_v22 = vmul.f32 %v2100_v7, %v2439_v52  ;;  %v2119_v24 = vunpack.c.l.bf16 %v2135_v11 }
  0xa5   : > { %2189 = vmatmul.mubr.msk.bf16.vlgmr.msra.gmra.mxu0 %vm430_vm0, %v2498_v48  ;;  %2201 = vmatmul.mubr.msk.bf16.vlgmr.msra.gmra.mxu1 %vm430_vm0, %v2498_v48  ;;  %v1069_v25 = vadd.f32 %v1065_v18, %v2468_v17  ;;  %v1070_v26 = vadd.f32 %v1066_v19, %v2454_v5  ;;  %v1396_v27 = vmul.f32 %v2112_v10, %v2430_v43  ;;  %v2115_v50 = vunpack.c.l.bf16 %v2134_v42 }
  0xa6   : > { %2209 = vmatpush3.bf16.msk.msra.mxu0 %vm2458_vm2, %v1955_v44  ;;  %2221 = vmatpush3.bf16.msk.msra.mxu1 %vm2458_vm2, %v1969_v45  ;;  %v1233_v28 = vadd.f32 %v1229_v20, %v2468_v17  ;;  %v1234_v29 = vadd.f32 %v1230_v22, %v2454_v5  ;;  %v1560_v30 = vmul.f32 %v2120_v15, %v2430_v43  ;;  %v2116_v51 = vunpack.c.h.bf16 %v2134_v42 }
  0xa7   : > { %2210 = vmatprep.subr.msk.bf16.mxu0 %vm2458_vm2, %v1958_v59  ;;  %2222 = vmatprep.subr.msk.bf16.mxu1 %vm2458_vm2, %v1972_v61  ;;  %v1395_v31 = vmul.f32 %v2111_v23, %v2415_v21  ;;  %v1559_v33 = vmul.f32 %v2119_v24, %v2415_v21  ;;  %v1073_v34 = vmax.f32 %v1069_v25, 0.0  ;;  %v1074_v35 = vmax.f32 %v1070_v26, 0.0 }
  0xa8   : > { %2192 = vmatprep.mubr.msk.bf16.mxu0 %vm430_vm0, %v2516_v57  ;;  %2204 = vmatprep.mubr.msk.bf16.mxu1 %vm430_vm0, %v2516_v57  ;;  %v1237_v36 = vmax.f32 %v1233_v28, 0.0  ;;  %v1238_v37 = vmax.f32 %v1234_v29, 0.0  ;;  %v1400_v38 = vadd.f32 %v1396_v27, %v2421_v32  ;;  %v1564_v39 = vadd.f32 %v1560_v30, %v2421_v32 }
  0xa9   : > { %v1399_v43 = vadd.f32 %v1395_v31, %v2411_v16  ;;  %v1563_v40 = vadd.f32 %v1559_v33, %v2411_v16  ;;  %v1986_v21 = vpack.c.bf16 %v1074_v35, %v1073_v34  ;;  %v2107_v32 = vunpack.c.l.bf16 %v2132_v41 }
  0xaa   : > { %2211 = vmatpush3.bf16.msk.msra.mxu0 %vm2458_vm2, %v1958_v59  ;;  %2223 = vmatpush3.bf16.msk.msra.mxu1 %vm2458_vm2, %v1972_v61  ;;  %v2000_v44 = vpack.c.bf16 %v1238_v37, %v1237_v36  ;;  %v1404_v45 = vmax.f32 %v1400_v38, 0.0  ;;  %v1568_v46 = vmax.f32 %v1564_v39, 0.0  ;;  %v2108_v16 = vunpack.c.h.bf16 %v2132_v41 }
  0xab   : > { %2232 = vmatprep.subr.msk.bf16.mxu0 %vm2458_vm2, %v1983_v12  ;;  %2244 = vmatprep.subr.msk.bf16.mxu1 %vm2458_vm2, %v1997_v13  ;;  %v1403_v47 = vmax.f32 %v1399_v43, 0.0  ;;  %v1567_v49 = vmax.f32 %v1563_v40, 0.0  ;;  %v1393_v55 = vmul.f32 %v2107_v32, %v2448_v60  ;;  %v1557_v58 = vmul.f32 %v2115_v50, %v2448_v60 }
  0xac   : > { %v1394_v56 = vmul.f32 %v2108_v16, %v2439_v52  ;;  %v1558_v59 = vmul.f32 %v2116_v51, %v2439_v52 }
  0xad   : > { %2193 = vmatmul.mubr.msk.bf16.gmra.mxu0 %vm430_vm0, %v2540_v14  ;;  %2205 = vmatmul.mubr.msk.bf16.gmra.mxu1 %vm430_vm0, %v2540_v14  ;;  %v2011_v53 = vpack.c.bf16 %v1404_v45, %v1403_v47  ;;  %v2025_v54 = vpack.c.bf16 %v1568_v46, %v1567_v49  ;;  %v1397_v61 = vadd.f32 %v1393_v55, %v2468_v17 }
  0xae   : > { %2212 = vmatprep.mubr.msk.bf16.mxu0 %vm430_vm0, %v2393_v9  ;;  %2224 = vmatprep.mubr.msk.bf16.mxu1 %vm430_vm0, %v2393_v9  ;;  %v1398_v62 = vadd.f32 %v1394_v56, %v2454_v5  ;;  %v1561_v63 = vadd.f32 %v1557_v58, %v2468_v17  ;;  %v1562_v0 = vadd.f32 %v1558_v59, %v2454_v5 }
  0xaf   : > { %v1401_v52 = vmax.f32 %v1397_v61, 0.0 }
  0xb0   : > { %v1402_v60 = vmax.f32 %v1398_v62, 0.0  ;;  %v1565_v1 = vmax.f32 %v1561_v63, 0.0  ;;  %v1566_v2 = vmax.f32 %v1562_v0, 0.0 }
  0xb2   : > { %v2014_v3 = vpack.c.bf16 %v1402_v60, %v1401_v52  ;;  %v2028_v17 = vpack.c.bf16 %v1566_v2, %v1565_v1 }
  0xb5   : > { %2213 = vmatmul.mubr.msk.bf16.vlgmr.msra.gmra.mxu0 %vm430_vm0, %v2498_v48  ;;  %2225 = vmatmul.mubr.msk.bf16.vlgmr.msra.gmra.mxu1 %vm430_vm0, %v2498_v48 }
  0xb6   : > { %2233 = vmatpush3.bf16.msk.msra.mxu0 %vm2458_vm2, %v1983_v12  ;;  %2245 = vmatpush3.bf16.msk.msra.mxu1 %vm2458_vm2, %v1997_v13 }
  0xb7   : > { %2234 = vmatprep.subr.msk.bf16.mxu0 %vm2458_vm2, %v1986_v21  ;;  %2246 = vmatprep.subr.msk.bf16.mxu1 %vm2458_vm2, %v2000_v44 }
  0xb8   : > { %2216 = vmatprep.mubr.msk.bf16.mxu0 %vm430_vm0, %v2516_v57  ;;  %2228 = vmatprep.mubr.msk.bf16.mxu1 %vm430_vm0, %v2516_v57 }
  0xba   : > { %2235 = vmatpush3.bf16.msk.msra.mxu0 %vm2458_vm2, %v1986_v21  ;;  %2247 = vmatpush3.bf16.msk.msra.mxu1 %vm2458_vm2, %v2000_v44 }
  0xbb   : > { %2256 = vmatprep.subr.msk.bf16.mxu0 %vm2458_vm2, %v2011_v53  ;;  %2268 = vmatprep.subr.msk.bf16.mxu1 %vm2458_vm2, %v2025_v54 }
  0xbd   : > { %2217 = vmatmul.mubr.msk.bf16.gmra.mxu0 %vm430_vm0, %v2540_v14  ;;  %2229 = vmatmul.mubr.msk.bf16.gmra.mxu1 %vm430_vm0, %v2540_v14 }
  0xbe   : > { %2236 = vmatprep.mubr.msk.bf16.mxu0 %vm430_vm0, %v2393_v9  ;;  %2248 = vmatprep.mubr.msk.bf16.mxu1 %vm430_vm0, %v2393_v9 }
  0xc5   : > { %2237 = vmatmul.mubr.msk.bf16.vlgmr.msra.gmra.mxu0 %vm430_vm0, %v2498_v48  ;;  %2249 = vmatmul.mubr.msk.bf16.vlgmr.msra.gmra.mxu1 %vm430_vm0, %v2498_v48 }
  0xc6   : > { %2257 = vmatpush3.bf16.msk.msra.mxu0 %vm2458_vm2, %v2011_v53  ;;  %2269 = vmatpush3.bf16.msk.msra.mxu1 %vm2458_vm2, %v2025_v54 }
  0xc7   : > { %2258 = vmatprep.subr.msk.bf16.mxu0 %vm2458_vm2, %v2014_v3  ;;  %2270 = vmatprep.subr.msk.bf16.mxu1 %vm2458_vm2, %v2028_v17 }
  0xc8   : > { %2240 = vmatprep.mubr.msk.bf16.mxu0 %vm430_vm0, %v2516_v57  ;;  %2252 = vmatprep.mubr.msk.bf16.mxu1 %vm430_vm0, %v2516_v57 }
  0xca   : > { %2259 = vmatpush3.bf16.msk.msra.mxu0 %vm2458_vm2, %v2014_v3  ;;  %2271 = vmatpush3.bf16.msk.msra.mxu1 %vm2458_vm2, %v2028_v17 }
  0xcd   : > { %2241 = vmatmul.mubr.msk.bf16.gmra.mxu0 %vm430_vm0, %v2540_v14  ;;  %2253 = vmatmul.mubr.msk.bf16.gmra.mxu1 %vm430_vm0, %v2540_v14 }
  0xce   : > { %2260 = vmatprep.mubr.msk.bf16.mxu0 %vm430_vm0, %v2393_v9  ;;  %2272 = vmatprep.mubr.msk.bf16.mxu1 %vm430_vm0, %v2393_v9 }
  0xd5   : > { %2261 = vmatmul.mubr.msk.bf16.vlgmr.msra.gmra.mxu0 %vm430_vm0, %v2498_v48  ;;  %2273 = vmatmul.mubr.msk.bf16.vlgmr.msra.gmra.mxu1 %vm430_vm0, %v2498_v48 }
  0xd6   : > { %2264 = vmatprep.mubr.msk.bf16.mxu0 %vm430_vm0, %v2516_v57  ;;  %2276 = vmatprep.mubr.msk.bf16.mxu1 %vm430_vm0, %v2516_v57 }
  0xdd   : > { %2265 = vmatmul.mubr.msk.bf16.gmra.mxu0 %vm430_vm0, %v2540_v14  ;;  %2277 = vmatmul.mubr.msk.bf16.gmra.mxu1 %vm430_vm0, %v2540_v14 }
 0x165   : > { %v2656_v5 = vpop.f32.mrf.mxu0  ;;  %v2658_v9 = vpop.f32.mrf.mxu1 }
 0x166   : > { %660 = vadd.xlane.f32.xlu1 %v2658_v9  ;;  %512 = vadd.xlane.f32.xlu0 %v2656_v5  ;;  %v534_v57 = vmul.f32 %v2656_v5, %v2656_v5  ;;  %v682_v15 = vmul.f32 %v2658_v9, %v2658_v9  ;;  %v714_v32 = vmax.f32 %v2656_v5, %v2658_v9 }
 0x167   : > { %v2662_v6 = vpop.f32.mrf.mxu0  ;;  %v2664_v48 = vpop.f32.mrf.mxu1  ;;  %v722_v16 = vmin.f32 %v2656_v5, %v2658_v9 }
 0x168   : > { %v532_v23 = vmul.f32 %v2662_v6, %v2662_v6  ;;  %v680_v29 = vmul.f32 %v2664_v48, %v2664_v48  ;;  %v712_v47 = vmax.f32 %v2662_v6, %v2664_v48  ;;  %v720_v49 = vmin.f32 %v2662_v6, %v2664_v48 }
 0x169   : > { %v2668_v4 = vpop.f32.mrf.mxu0  ;;  %v2670_v7 = vpop.f32.mrf.mxu1 }
 0x16a   : > { %544 = vadd.xlane.f32.xlu1 %v534_v57  ;;  %508 = vadd.xlane.f32.xlu0 %v2662_v6  ;;  %v535_v24 = vmul.f32 %v2668_v4, %v2668_v4  ;;  %v683_v36 = vmul.f32 %v2670_v7, %v2670_v7  ;;  %v715_v50 = vmax.f32 %v2668_v4, %v2670_v7 }
 0x16b   : > { %v2673_v8 = vpop.f32.mrf.mxu0  ;;  %v2675_v10 = vpop.f32.mrf.mxu1  ;;  %v723_v51 = vmin.f32 %v2668_v4, %v2670_v7 }
 0x16c   : > { %v533_v40 = vmul.f32 %v2673_v8, %v2673_v8  ;;  %v681_v45 = vmul.f32 %v2675_v10, %v2675_v10  ;;  %v713_v53 = vmax.f32 %v2673_v8, %v2675_v10  ;;  %v721_v54 = vmin.f32 %v2673_v8, %v2675_v10 }
 0x16d   : > { %v2677_v11 = vpop.f32.mrf.mxu0  ;;  %v2679_v12 = vpop.f32.mrf.mxu1 }
 0x16e   : > { %656 = vadd.xlane.f32.xlu1 %v2664_v48  ;;  %514 = vadd.xlane.f32.xlu0 %v2668_v4  ;;  %v718_v58 = vmax.f32 %v2677_v11, %v2679_v12  ;;  %v726_v59 = vmin.f32 %v2677_v11, %v2679_v12  ;;  %v538_v61 = vmul.f32 %v2677_v11, %v2677_v11 }
 0x16f   : > { %v2683_v13 = vpop.f32.mrf.mxu0  ;;  %v2685_v14 = vpop.f32.mrf.mxu1  ;;  %v2778_v62 = vmul.f32 %v2679_v12, %v2679_v12 }
 0x170   : > { %v716_v63 = vmax.f32 %v2683_v13, %v2685_v14  ;;  %v724_v0 = vmin.f32 %v2683_v13, %v2685_v14  ;;  %v2795_v5 = vmul.f32 %v2683_v13, %v2683_v13  ;;  %v2799_v9 = vmul.f32 %v2685_v14, %v2685_v14 }
 0x171   : > { %v2689_v18 = vpop.f32.mrf.mxu0  ;;  %v2691_v19 = vpop.f32.mrf.mxu1 }
 0x172   : > { %692 = vadd.xlane.f32.xlu1 %v682_v15  ;;  %662 = vadd.xlane.f32.xlu0 %v2670_v7  ;;  %v719_v6 = vmax.f32 %v2689_v18, %v2691_v19  ;;  %v727_v48 = vmin.f32 %v2689_v18, %v2691_v19 }
 0x173   : > { %v2694_v20 = vpop.f32.mrf.mxu0  ;;  %v2696_v22 = vpop.f32.mrf.mxu1 }
 0x175   : > { %v2702_v25 = vpop.f32.mrf.mxu0  ;;  %v2704_v26 = vpop.f32.mrf.mxu1 }
 0x176   : > { %540 = vadd.xlane.f32.xlu1 %v532_v23  ;;  %546 = vadd.xlane.f32.xlu0 %v535_v24  ;;  %v878_v52 = vmax.f32 %v714_v32, %v2702_v25  ;;  %v886_v60 = vmin.f32 %v722_v16, %v2702_v25 }
 0x177   : > { %v2706_v27 = vpop.f32.mrf.mxu0  ;;  %v2708_v28 = vpop.f32.mrf.mxu1 }
 0x178   : > { %v876_v3 = vmax.f32 %v712_v47, %v2706_v27  ;;  %v884_v17 = vmin.f32 %v720_v49, %v2706_v27  ;;  %v1042_v15 = vmax.f32 %v878_v52, %v2704_v26  ;;  %v1050_v23 = vmin.f32 %v886_v60, %v2704_v26 }
 0x179   : > { %v2712_v30 = vpop.f32.mrf.mxu0  ;;  %v2714_v31 = vpop.f32.mrf.mxu1 }
 0x17a   : > { %688 = vadd.xlane.f32.xlu1 %v680_v29  ;;  %658 = vadd.xlane.f32.xlu0 %v2675_v10  ;;  %v879_v57 = vmax.f32 %v715_v50, %v2712_v30  ;;  %v887_v4 = vmin.f32 %v723_v51, %v2712_v30  ;;  %v717_v10 = vmax.f32 %v2694_v20, %v2696_v22 }
 0x17b   : > { %v2717_v33 = vpop.f32.mrf.mxu0  ;;  %v2719_v34 = vpop.f32.mrf.mxu1 }
 0x17c   : > { %v877_v24 = vmax.f32 %v713_v53, %v2717_v33  ;;  %v885_v29 = vmin.f32 %v721_v54, %v2717_v33  ;;  %v1043_v47 = vmax.f32 %v879_v57, %v2714_v31  ;;  %v1051_v49 = vmin.f32 %v887_v4, %v2714_v31 }
 0x17d   : > { %v2721_v35 = vpop.f32.mrf.mxu0  ;;  %v2725_v37 = vpop.f32.mrf.mxu1 }
 0x17e   : > { %510 = vadd.xlane.f32.xlu1 %v2673_v8  ;;  %694 = vadd.xlane.f32.xlu0 %v683_v36  ;;  %v882_v32 = vmax.f32 %v718_v58, %v2721_v35  ;;  %v890_v16 = vmin.f32 %v726_v59, %v2721_v35 }
 0x17f   : > { %v2728_v38 = vpop.f32.mrf.mxu0  ;;  %v2730_v39 = vpop.f32.mrf.mxu1 }
 0x180   : > { %v880_v50 = vmax.f32 %v716_v63, %v2728_v38  ;;  %v888_v51 = vmin.f32 %v724_v0, %v2728_v38  ;;  %v1041_v63 = vmax.f32 %v877_v24, %v2719_v34  ;;  %v1049_v0 = vmin.f32 %v885_v29, %v2719_v34 }
 0x181   : > { %v2732_v43 = vpop.f32.mrf.mxu0  ;;  %v2736_v41 = vpop.f32.mrf.mxu1 }
 0x182   : > { %520 = vadd.xlane.f32.xlu1 %v2677_v11  ;;  %542 = vadd.xlane.f32.xlu0 %v533_v40  ;;  %v725_v11 = vmin.f32 %v2694_v20, %v2696_v22  ;;  %v2844_v52 = vmax.f32 %v719_v6, %v2732_v43  ;;  %v2847_v58 = vmin.f32 %v727_v48, %v2732_v43 }
 0x183   : > { %v2739_v42 = vpop.f32.mrf.mxu0  ;;  %v2741_v21 = vpop.f32.mrf.mxu1  ;;  %v1046_v6 = vmax.f32 %v882_v32, %v2725_v37  ;;  %v1054_v48 = vmin.f32 %v890_v16, %v2725_v37 }
 0x184   : > { %v2857_v60 = vmin.f32 %v725_v11, %v2739_v42 }
 0x185   : > { %v2743_v44 = vpop.f32.mrf.mxu0  ;;  %v2747_v46 = vpop.f32.mrf.mxu1 }
 0x186   : > { %668 = vadd.xlane.f32.xlu1 %v2679_v12  ;;  %690 = vadd.xlane.f32.xlu0 %v681_v45  ;;  %v539_v12 = vmul.f32 %v2689_v18, %v2689_v18  ;;  %v1040_v45 = vmax.f32 %v876_v3, %v2708_v28  ;;  %v1206_v59 = vmax.f32 %v1042_v15, %v2743_v44 }
 0x187   : > { %v2766_v55 = vpop.f32.mrf.mxu0  ;;  %v2768_v56 = vpop.f32.mrf.mxu1  ;;  %v1052_v15 = vmin.f32 %v888_v51, %v2730_v39 }
 0x188   : > { %v1204_v57 = vmax.f32 %v1040_v45, %v2766_v55  ;;  %v1047_v45 = vmax.f32 %v2844_v52, %v2736_v41 }
 0x189   : > { %v2786_v1 = vpop.f32.mrf.mxu0  ;;  %v2788_v2 = vpop.f32.mrf.mxu1 }
 0x18a   : > { %3346 = vst [vmem:[#allocation2_spill] sm:$0xff] %v2786_v1  ;;  %516 = vadd.xlane.f32.xlu1 %v2683_v13  ;;  %522 = vadd.xlane.f32.xlu0 %v2689_v18  ;;  %v2820_v13 = vmul.f32 %v2691_v19, %v2691_v19  ;;  %v1048_v18 = vmin.f32 %v884_v17, %v2708_v28 }
 0x18b   : > { %v2808_v7 = vpop.f32.mrf.mxu0  ;;  %v2810_v8 = vpop.f32.mrf.mxu1  ;;  %v1207_v11 = vmax.f32 %v1043_v47, %v2786_v1  ;;  %v1053_v47 = vmin.f32 %v2857_v60, %v2741_v21 }
 0x18c   : > { %v1212_v4 = vmin.f32 %v1048_v18, %v2766_v55  ;;  %v1370_v18 = vmax.f32 %v1206_v59, %v2747_v46 }
 0x18d   : > { %v2826_v36 = vpop.f32.mrf.mxu0  ;;  %v2828_v40 = vpop.f32.mrf.mxu1 }
 0x18e   : > { %3347 = vst [vmem:[#allocation3_spill] sm:$0xff] %v2826_v36  ;;  %552 = vadd.xlane.f32.xlu1 %v538_v61  ;;  %670 = vadd.xlane.f32.xlu0 %v2691_v19  ;;  %v1214_v61 = vmin.f32 %v1050_v23, %v2743_v44  ;;  %v2854_v19 = vmax.f32 %v717_v10, %v2739_v42 }
 0x18f   : > { %v2839_v53 = vpop.f32.mrf.mxu0  ;;  %v2841_v54 = vpop.f32.mrf.mxu1  ;;  %v1044_v10 = vmax.f32 %v880_v50, %v2730_v39  ;;  %v1215_v23 = vmin.f32 %v1051_v49, %v2786_v1  ;;  %v1205_v49 = vmax.f32 %v1041_v63, %v2808_v7  ;;  %v1213_v50 = vmin.f32 %v1049_v0, %v2808_v7 }
 0x190   : > { %v1378_v32 = vmin.f32 %v1214_v61, %v2747_v46  ;;  %v1045_v16 = vmax.f32 %v2854_v19, %v2741_v21  ;;  %v1376_v59 = vmin.f32 %v1212_v4, %v2768_v56  ;;  %v1371_v63 = vmax.f32 %v1207_v11, %v2788_v2 }
 0x191   : > { %v2859_v3 = vpop.f32.mrf.mxu0  ;;  %v2861_v17 = vpop.f32.mrf.mxu1  ;;  %v1379_v0 = vmin.f32 %v1215_v23, %v2788_v2  ;;  %v1210_v19 = vmax.f32 %v1046_v6, %v2826_v36  ;;  %v1218_v60 = vmin.f32 %v1054_v48, %v2826_v36  ;;  %v1369_v23 = vmax.f32 %v1205_v49, %v2810_v8 }
 0x192   : > { %664 = vadd.xlane.f32.xlu1 %v2685_v14  ;;  %518 = vadd.xlane.f32.xlu0 %v2694_v20  ;;  %v1055_v14 = vmin.f32 %v2847_v58, %v2736_v41  ;;  %v1368_v58 = vmax.f32 %v1204_v57, %v2768_v56  ;;  %v1377_v6 = vmin.f32 %v1213_v50, %v2810_v8 }
 0x193   : > { %v2873_v24 = vpop.f32.mrf.mxu0  ;;  %v2875_v29 = vpop.f32.mrf.mxu1 }
 0x195   : > { %v2889_v51 = vpop.f32.mrf.mxu0  ;;  %v2891_v52 = vpop.f32.mrf.mxu1 }
 0x196   : > { %3348 = vst [vmem:[#allocation4_spill] sm:$0xff] %v2889_v51  ;;  %v1534_v61 = vmax.f32 %v1370_v18, %v2889_v51  ;;  %v1542_v1 = vmin.f32 %v1378_v32, %v2889_v51  ;;  %700 = vadd.xlane.f32.xlu1 %v2778_v62  ;;  %554 = vadd.xlane.f32.xlu0 %v539_v12 }
 0x197   : > { %v2908_v57 = vpop.f32.mrf.mxu0  ;;  %v2910_v4 = vpop.f32.mrf.mxu1  ;;  %v1208_v51 = vmax.f32 %v1044_v10, %v2839_v53  ;;  %v1216_v12 = vmin.f32 %v1052_v15, %v2839_v53  ;;  %v1374_v10 = vmax.f32 %v1210_v19, %v2828_v40  ;;  %v1382_v15 = vmin.f32 %v1218_v60, %v2828_v40 }
 0x198   : > { %v1532_v62 = vmax.f32 %v1368_v58, %v2908_v57  ;;  %v1540_v18 = vmin.f32 %v1376_v59, %v2908_v57  ;;  %v1698_v32 = vmax.f32 %v1534_v61, %v2891_v52  ;;  %v1706_v11 = vmin.f32 %v1542_v1, %v2891_v52 }
 0x199   : > { %v2920_v48 = vpop.f32.mrf.mxu0  ;;  %v2922_v36 = vpop.f32.mrf.mxu1  ;;  %v1211_v59 = vmax.f32 %v1047_v45, %v2859_v3  ;;  %v1219_v61 = vmin.f32 %v1055_v14, %v2859_v3  ;;  %v1372_v14 = vmax.f32 %v1208_v51, %v2841_v54 }
 0x19a   : > { %1714 = vst [vmem:[%s2902_s18 + $0x10] sm:$0xff] %v1698_v32  ;;  %2036 = vst [vmem:[%s2902_s18 + $0x50] sm:$0xff] %v1706_v11  ;;  %v1535_v58 = vmax.f32 %v1371_v63, %v2920_v48  ;;  %v1543_v1 = vmin.f32 %v1379_v0, %v2920_v48  ;;  %v1696_v49 = vmax.f32 %v1532_v62, %v2910_v4  ;;  %548 = vadd.xlane.f32.xlu1 %v2795_v5 }
 0x19b   : > { %v1704_v50 = vmin.f32 %v1540_v18, %v2910_v4  ;;  %666 = vadd.xlane.f32.xlu0 %v2696_v22  ;;  %v2936_v63 = vpop.f32.mrf.mxu0  ;;  %v2938_v0 = vpop.f32.mrf.mxu1  ;;  %v1380_v62 = vmin.f32 %v1216_v12, %v2841_v54  ;;  %v1209_v18 = vmax.f32 %v1045_v16, %v2873_v24  ;;  %v1217_v32 = vmin.f32 %v1053_v47, %v2873_v24 }
 0x19c   : > { %1712 = vst [vmem:[%s2902_s18] sm:$0xff] %v1696_v49  ;;  %v1533_v5 = vmax.f32 %v1369_v23, %v2936_v63  ;;  %v1541_v19 = vmin.f32 %v1377_v6, %v2936_v63  ;;  %v1699_v60 = vmax.f32 %v1535_v58, %v2922_v36  ;;  %v1707_v45 = vmin.f32 %v1543_v1, %v2922_v36 }
 0x19d   : > { %2034 = vst [vmem:[%s2902_s18 + $0x40] sm:$0xff] %v1704_v50  ;;  %v2950_v11 = vpop.f32.mrf.mxu0  ;;  %v2952_v49 = vpop.f32.mrf.mxu1  ;;  %v1375_v16 = vmax.f32 %v1211_v59, %v2861_v17  ;;  %v1383_v47 = vmin.f32 %v1219_v61, %v2861_v17  ;;  %v1373_v61 = vmax.f32 %v1209_v18, %v2875_v29 }
 0x19e   : > { %1715 = vst [vmem:[%s2902_s18 + $0x18] sm:$0xff] %v1699_v60  ;;  %2037 = vst [vmem:[%s2902_s18 + $0x58] sm:$0xff] %v1707_v45  ;;  %v1538_v23 = vmax.f32 %v1374_v10, %v2950_v11  ;;  %v1546_v6 = vmin.f32 %v1382_v15, %v2950_v11  ;;  %v1697_v51 = vmax.f32 %v1533_v5, %v2938_v0  ;;  %696 = vadd.xlane.f32.xlu1 %v2799_v9 }
 0x19f   : > { %v1705_v12 = vmin.f32 %v1541_v19, %v2938_v0  ;;  %702 = vadd.xlane.f32.xlu0 %v2820_v13  ;;  %v2964_v58 = vpop.f32.mrf.mxu0  ;;  %v2966_v1 = vpop.f32.mrf.mxu1  ;;  %v537_v13 = vmul.f32 %v2694_v20, %v2694_v20  ;;  %v1381_v5 = vmin.f32 %v1217_v32, %v2875_v29 }
 0x1a0   : > { %1713 = vst [vmem:[%s2902_s18 + $0x8] sm:$0xff] %v1697_v51  ;;  %v1536_v50 = vmax.f32 %v1372_v14, %v2964_v58  ;;  %v1544_v10 = vmin.f32 %v1380_v62, %v2964_v58  ;;  %v1702_v9 = vmax.f32 %v1538_v23, %v2952_v49  ;;  %v1710_v15 = vmin.f32 %v1546_v6, %v2952_v49 }
 0x1a1   : > { %2035 = vst [vmem:[%s2902_s18 + $0x48] sm:$0xff] %v1705_v12  ;;  %v2974_v59 = vpop.f32.mrf.mxu0  ;;  %v2980_v19 = vpop.f32.mrf.mxu1  ;;  %v685_v12 = vmul.f32 %v2696_v22, %v2696_v22  ;;  %v1010_v22 = vmul.f32 %v2704_v26, %v2704_v26 }
 0x1a2   : > { %1718 = vst [vmem:[%s2902_s18 + $0x30] sm:$0xff] %v1702_v9  ;;  %2040 = vst [vmem:[%s2902_s18 + $0x70] sm:$0xff] %v1710_v15  ;;  %v1539_v60 = vmax.f32 %v1375_v16, %v2974_v59  ;;  %v1547_v45 = vmin.f32 %v1383_v47, %v2974_v59  ;;  %v1700_v14 = vmax.f32 %v1536_v50, %v2966_v1  ;;  %824 = vadd.xlane.f32.xlu1 %v2702_v25 }
 0x1a3   : > { %v1708_v62 = vmin.f32 %v1544_v10, %v2966_v1  ;;  %550 = vadd.xlane.f32.xlu0 %v537_v13  ;;  %v2989_v20 = vpop.f32.mrf.mxu0  ;;  %v2991_v18 = vpop.f32.mrf.mxu1  ;;  %v846_v50 = vmul.f32 %v2702_v25, %v2702_v25  ;;  %v847_v10 = vmul.f32 %v2712_v30, %v2712_v30  ;;  %v844_v9 = vmul.f32 %v2706_v27, %v2706_v27 }
 0x1a4   : > { %1716 = vst [vmem:[%s2902_s18 + $0x20] sm:$0xff] %v1700_v14  ;;  %v1537_v32 = vmax.f32 %v1373_v61, %v2989_v20  ;;  %v1545_v23 = vmin.f32 %v1381_v5, %v2989_v20  ;;  %v1703_v6 = vmax.f32 %v1539_v60, %v2980_v19  ;;  %v1711_v51 = vmin.f32 %v1547_v45, %v2980_v19 }
 0x1a5   : > { %2038 = vst [vmem:[%s2902_s18 + $0x60] sm:$0xff] %v1708_v62  ;;  %v1008_v25 = vmul.f32 %v2708_v28, %v2708_v28  ;;  %v1011_v15 = vmul.f32 %v2714_v31, %v2714_v31  ;;  %v1338_v5 = vmul.f32 %v2747_v46, %v2747_v46  ;;  %v1172_v62 = vmul.f32 %v2766_v55, %v2766_v55 }
 0x1a6   : > { %1719 = vst [vmem:[%s2902_s18 + $0x38] sm:$0xff] %v1703_v6  ;;  %v1701_v16 = vmax.f32 %v1537_v32, %v2991_v18  ;;  %v1709_v47 = vmin.f32 %v1545_v23, %v2991_v18  ;;  %988 = vadd.xlane.f32.xlu1 %v2704_v26  ;;  %2041 = vst [vmem:[%s2902_s18 + $0x78] sm:$0xff] %v1711_v51  ;;  %v845_v26 = vmul.f32 %v2717_v33, %v2717_v33 }
 0x1a7   : > { %698 = vadd.xlane.f32.xlu0 %v685_v12  ;;  %v1336_v51 = vmul.f32 %v2768_v56, %v2768_v56  ;;  %v1339_v12 = vmul.f32 %v2788_v2, %v2788_v2 }
 0x1a8   : > { %1717 = vst [vmem:[%s2902_s18 + $0x28] sm:$0xff] %v1701_v16  ;;  %2039 = vst [vmem:[%s2902_s18 + $0x68] sm:$0xff] %v1709_v47 }
 0x1aa   : > { %820 = vadd.xlane.f32.xlu1 %v2706_v27  ;;  %v1009_v27 = vmul.f32 %v2719_v34, %v2719_v34 }
 0x1ab   : > { %826 = vadd.xlane.f32.xlu0 %v2712_v30  ;;  %v1014_v30 = vmul.f32 %v2725_v37, %v2725_v37 }
 0x1ae   : > { %856 = vadd.xlane.f32.xlu1 %v846_v50  ;;  %v3350_v50 = vld [vmem:[#allocation3_spill] sm:$0xff] }
 0x1af   : > { %990 = vadd.xlane.f32.xlu0 %v2714_v31  ;;  %v851_v31 = vmul.f32 %v2732_v43, %v2732_v43 }
 0x1b2   : > { %984 = vadd.xlane.f32.xlu1 %v2708_v28  ;;  %v850_v28 = vmul.f32 %v2721_v35, %v2721_v35 }
 0x1b3   : > { %822 = vadd.xlane.f32.xlu0 %v2717_v33  ;;  %v848_v33 = vmul.f32 %v2728_v38, %v2728_v38 }
 0x1b6   : > { %1020 = vadd.xlane.f32.xlu1 %v1010_v22 }
 0x1b7   : > { %858 = vadd.xlane.f32.xlu0 %v847_v10 }
 0x1ba   : > { %852 = vadd.xlane.f32.xlu1 %v844_v9 }
 0x1bb   : > { %986 = vadd.xlane.f32.xlu0 %v2719_v34  ;;  %v1012_v34 = vmul.f32 %v2730_v39, %v2730_v39 }
 0x1be   : > { %1016 = vadd.xlane.f32.xlu1 %v1008_v25 }
 0x1bf   : > { %1022 = vadd.xlane.f32.xlu0 %v1011_v15 }
 0x1c2   : > { %832 = vadd.xlane.f32.xlu1 %v2721_v35  ;;  %v1015_v35 = vmul.f32 %v2736_v41, %v2736_v41 }
 0x1c3   : > { %854 = vadd.xlane.f32.xlu0 %v845_v26 }
 0x1c6   : > { %996 = vadd.xlane.f32.xlu1 %v2725_v37  ;;  %v849_v37 = vmul.f32 %v2739_v42, %v2739_v42 }
 0x1c7   : > { %1018 = vadd.xlane.f32.xlu0 %v1009_v27 }
 0x1ca   : > { %828 = vadd.xlane.f32.xlu1 %v2728_v38  ;;  %v1013_v38 = vmul.f32 %v2741_v21, %v2741_v21 }
 0x1cb   : > { %834 = vadd.xlane.f32.xlu0 %v2732_v43  ;;  %v1174_v43 = vmul.f32 %v2743_v44, %v2743_v44 }
 0x1ce   : > { %864 = vadd.xlane.f32.xlu1 %v850_v28  ;;  %v1178_v28 = vmul.f32 %v3350_v50, %v3350_v50 }
 0x1cf   : > { %998 = vadd.xlane.f32.xlu0 %v2736_v41 }
 0x1d2   : > { %992 = vadd.xlane.f32.xlu1 %v2730_v39  ;;  %v3349_v39 = vld [vmem:[#allocation2_spill] sm:$0xff] }
 0x1d3   : > { %830 = vadd.xlane.f32.xlu0 %v2739_v42  ;;  %v1175_v60 = vmul.f32 %v3349_v39, %v3349_v39 }
 0x1d6   : > { %1028 = vadd.xlane.f32.xlu1 %v1014_v30 }
 0x1d7   : > { %866 = vadd.xlane.f32.xlu0 %v851_v31 }
 0x1da   : > { %860 = vadd.xlane.f32.xlu1 %v848_v33 }
 0x1db   : > { %994 = vadd.xlane.f32.xlu0 %v2741_v21 }
 0x1de   : > { %1024 = vadd.xlane.f32.xlu1 %v1012_v34 }
 0x1df   : > { %1030 = vadd.xlane.f32.xlu0 %v1015_v35 }
 0x1e2   : > { %1152 = vadd.xlane.f32.xlu1 %v2743_v44 }
 0x1e3   : > { %862 = vadd.xlane.f32.xlu0 %v849_v37  ;;  %v1342_v37 = vmul.f32 %v2828_v40, %v2828_v40 }
 0x1e6   : > { %1316 = vadd.xlane.f32.xlu1 %v2747_v46 }
 0x1e7   : > { %1026 = vadd.xlane.f32.xlu0 %v1013_v38  ;;  %v1179_v38 = vmul.f32 %v2859_v3, %v2859_v3 }
 0x1ea   : > { %1148 = vadd.xlane.f32.xlu1 %v2766_v55  ;;  %v1173_v55 = vmul.f32 %v2808_v7, %v2808_v7 }
 0x1eb   : > { %1154 = vadd.xlane.f32.xlu0 %v3349_v39 }
 0x1ee   : > { %1184 = vadd.xlane.f32.xlu1 %v1174_v43 }
 0x1ef   : > { %1318 = vadd.xlane.f32.xlu0 %v2788_v2  ;;  %v661_v41 = vpop.xlane.xlu1 %660  ;;  %v513_v42 = vpop.xlane.xlu0 %512 }
 0x1f0   : > { %v3061_v13 = vadd.f32 %v661_v41, %v513_v42  ;;  %v1176_v41 = vmul.f32 %v2839_v53, %v2839_v53 }
 0x1f2   : > { %1312 = vadd.xlane.f32.xlu1 %v2768_v56  ;;  %v1337_v56 = vmul.f32 %v2810_v8, %v2810_v8 }
 0x1f3   : > { %1150 = vadd.xlane.f32.xlu0 %v2808_v7  ;;  %v545_v21 = vpop.xlane.xlu1 %544  ;;  %v509_v61 = vpop.xlane.xlu0 %508 }
 0x1f6   : > { %1348 = vadd.xlane.f32.xlu1 %v1338_v5 }
 0x1f7   : > { %1186 = vadd.xlane.f32.xlu0 %v1175_v60  ;;  %v657_v44 = vpop.xlane.xlu1 %656  ;;  %v515_v45 = vpop.xlane.xlu0 %514 }
 0x1f8   : > { %v3069_v14 = vadd.f32 %v657_v44, %v509_v61 }
 0x1fa   : > { %1180 = vadd.xlane.f32.xlu1 %v1172_v62  ;;  %v3351_v62 = vld [vmem:[#allocation4_spill] sm:$0xff] }
 0x1fb   : > { %1314 = vadd.xlane.f32.xlu0 %v2810_v8  ;;  %v693_v32 = vpop.xlane.xlu1 %692  ;;  %v663_v23 = vpop.xlane.xlu0 %662 }
 0x1fc   : > { %v3074_v6 = vadd.f32 %v693_v32, %v545_v21  ;;  %v3076_v46 = vadd.f32 %v663_v23, %v515_v45  ;;  %v1177_v45 = vmul.f32 %v2873_v24, %v2873_v24 }
 0x1fe   : > { %1344 = vadd.xlane.f32.xlu1 %v1336_v51 }
 0x1ff   : > { %1350 = vadd.xlane.f32.xlu0 %v1339_v12  ;;  %v541_v16 = vpop.xlane.xlu1 %540  ;;  %v547_v47 = vpop.xlane.xlu0 %546 }
 0x202   : > { %1160 = vadd.xlane.f32.xlu1 %v3350_v50 }
 0x203   : > { %1182 = vadd.xlane.f32.xlu0 %v1173_v55  ;;  %v689_v22 = vpop.xlane.xlu1 %688  ;;  %v659_v9 = vpop.xlane.xlu0 %658 }
 0x204   : > { %v3085_v10 = vadd.f32 %v689_v22, %v541_v16 }
 0x206   : > { %1324 = vadd.xlane.f32.xlu1 %v2828_v40  ;;  %v1340_v40 = vmul.f32 %v2841_v54, %v2841_v54 }
 0x207   : > { %1346 = vadd.xlane.f32.xlu0 %v1337_v56  ;;  %v511_v2 = vpop.xlane.xlu1 %510  ;;  %v695_v25 = vpop.xlane.xlu0 %694 }
 0x208   : > { %v3090_v15 = vadd.f32 %v659_v9, %v511_v2  ;;  %v3092_v26 = vadd.f32 %v695_v25, %v547_v47 }
 0x20a   : > { %1156 = vadd.xlane.f32.xlu1 %v2839_v53 }
 0x20b   : > { %1162 = vadd.xlane.f32.xlu0 %v2859_v3  ;;  %v521_v7 = vpop.xlane.xlu1 %520  ;;  %v543_v27 = vpop.xlane.xlu0 %542  ;;  %v1343_v3 = vmul.f32 %v2861_v17, %v2861_v17 }
 0x20e   : > { %1192 = vadd.xlane.f32.xlu1 %v1178_v28 }
 0x20f   : > { %1326 = vadd.xlane.f32.xlu0 %v2861_v17  ;;  %v669_v8 = vpop.xlane.xlu1 %668  ;;  %v691_v30 = vpop.xlane.xlu0 %690 }
 0x210   : > { %v3099_v31 = vadd.f32 %v669_v8, %v521_v7  ;;  %v3101_v33 = vadd.f32 %v691_v30, %v543_v27  ;;  %v1666_v27 = vmul.f32 %v2891_v52, %v2891_v52  ;;  %v1503_v8 = vmul.f32 %v2920_v48, %v2920_v48 }
 0x212   : > { %1320 = vadd.xlane.f32.xlu1 %v2841_v54  ;;  %v1341_v54 = vmul.f32 %v2875_v29, %v2875_v29 }
 0x213   : > { %1158 = vadd.xlane.f32.xlu0 %v2873_v24  ;;  %v517_v34 = vpop.xlane.xlu1 %516  ;;  %v523_v35 = vpop.xlane.xlu0 %522 }
 0x216   : > { %1356 = vadd.xlane.f32.xlu1 %v1342_v37  ;;  %v1500_v37 = vmul.f32 %v2908_v57, %v2908_v57 }
 0x217   : > { %1194 = vadd.xlane.f32.xlu0 %v1179_v38  ;;  %v553_v39 = vpop.xlane.xlu1 %552  ;;  %v671_v43 = vpop.xlane.xlu0 %670 }
 0x218   : > { %v3111_v42 = vadd.f32 %v671_v43, %v523_v35 }
 0x21a   : > { %1188 = vadd.xlane.f32.xlu1 %v1176_v41 }
 0x21b   : > { %1322 = vadd.xlane.f32.xlu0 %v2875_v29  ;;  %v665_v21 = vpop.xlane.xlu1 %664  ;;  %v519_v5 = vpop.xlane.xlu0 %518  ;;  %v1502_v29 = vmul.f32 %v3351_v62, %v3351_v62 }
 0x21c   : > { %v3114_v61 = vadd.f32 %v665_v21, %v517_v34 }
 0x21e   : > { %1352 = vadd.xlane.f32.xlu1 %v1340_v40 }
 0x21f   : > { %1358 = vadd.xlane.f32.xlu0 %v1343_v3  ;;  %v701_v60 = vpop.xlane.xlu1 %700  ;;  %v555_v53 = vpop.xlane.xlu0 %554 }
 0x220   : > { %v3120_v44 = vadd.f32 %v701_v60, %v553_v39 }
 0x222   : > { %1480 = vadd.xlane.f32.xlu1 %v3351_v62 }
 0x223   : > { %1190 = vadd.xlane.f32.xlu0 %v1177_v45  ;;  %v549_v32 = vpop.xlane.xlu1 %548 }
 0x224   : > { %v667_v23 = vpop.xlane.xlu0 %666 }
 0x225   : > { %v3125_v51 = vadd.f32 %v667_v23, %v519_v5  ;;  %v1501_v5 = vmul.f32 %v2936_v63, %v2936_v63 }
 0x226   : > { %1644 = vadd.xlane.f32.xlu1 %v2891_v52 }
 0x227   : > { %1354 = vadd.xlane.f32.xlu0 %v1341_v54  ;;  %v697_v17 = vpop.xlane.xlu1 %696 }
 0x228   : > { %v3130_v12 = vadd.f32 %v697_v17, %v549_v32  ;;  %v703_v16 = vpop.xlane.xlu0 %702 }
 0x229   : > { %v3132_v47 = vadd.f32 %v703_v16, %v555_v53 }
 0x22a   : > { %1476 = vadd.xlane.f32.xlu1 %v2908_v57 }
 0x22b   : > { %1482 = vadd.xlane.f32.xlu0 %v2920_v48  ;;  %v825_v24 = vpop.xlane.xlu1 %824  ;;  %v1664_v48 = vmul.f32 %v2910_v4, %v2910_v4 }
 0x22c   : > { %v838_v55 = vadd.f32 %v825_v24, %v3061_v13  ;;  %v551_v50 = vpop.xlane.xlu0 %550 }
 0x22e   : > { %1512 = vadd.xlane.f32.xlu1 %v1502_v29 }
 0x22f   : > { %1646 = vadd.xlane.f32.xlu0 %v2922_v36  ;;  %v989_v22 = vpop.xlane.xlu1 %988 }
 0x230   : > { %v3140_v9 = vadd.f32 %v989_v22, %v838_v55  ;;  %v699_v56 = vpop.xlane.xlu0 %698 }
 0x231   : > { %v3142_v2 = vadd.f32 %v699_v56, %v551_v50  ;;  %v1507_v50 = vmul.f32 %v2974_v59, %v2974_v59 }
 0x232   : > { %1640 = vadd.xlane.f32.xlu1 %v2910_v4 }
 0x233   : > { %1478 = vadd.xlane.f32.xlu0 %v2936_v63  ;;  %v821_v25 = vpop.xlane.xlu1 %820 }
 0x234   : > { %v836_v13 = vadd.f32 %v821_v25, %v3069_v14  ;;  %v827_v7 = vpop.xlane.xlu0 %826  ;;  %v1668_v25 = vmul.f32 %v2966_v1, %v2966_v1 }
 0x235   : > { %v839_v28 = vadd.f32 %v827_v7, %v3076_v46  ;;  %v1505_v7 = vmul.f32 %v2989_v20, %v2989_v20 }
 0x236   : > { %1676 = vadd.xlane.f32.xlu1 %v1666_v27 }
 0x237   : > { %1514 = vadd.xlane.f32.xlu0 %v1503_v8  ;;  %v857_v30 = vpop.xlane.xlu1 %856  ;;  %v1669_v8 = vmul.f32 %v2991_v18, %v2991_v18 }
 0x238   : > { %v870_v34 = vadd.f32 %v857_v30, %v3074_v6  ;;  %v991_v35 = vpop.xlane.xlu0 %990  ;;  %v1667_v6 = vmul.f32 %v2922_v36, %v2922_v36  ;;  %v1665_v36 = vmul.f32 %v2938_v0, %v2938_v0 }
 0x239   : > { %v3155_v38 = vadd.f32 %v991_v35, %v839_v28 }
 0x23a   : > { %1508 = vadd.xlane.f32.xlu1 %v1500_v37 }
 0x23b   : > { %1642 = vadd.xlane.f32.xlu0 %v2938_v0  ;;  %v985_v52 = vpop.xlane.xlu1 %984  ;;  %v1506_v0 = vmul.f32 %v2950_v11, %v2950_v11 }
 0x23c   : > { %v3158_v14 = vadd.f32 %v985_v52, %v836_v13  ;;  %v823_v46 = vpop.xlane.xlu0 %822 }
 0x23d   : > { %v837_v39 = vadd.f32 %v823_v46, %v3090_v15 }
 0x23e   : > { %1672 = vadd.xlane.f32.xlu1 %v1664_v48 }
 0x23f   : > { %1678 = vadd.xlane.f32.xlu0 %v1667_v6  ;;  %v1021_v57 = vpop.xlane.xlu1 %1020 }
 0x240   : > { %v3165_v43 = vadd.f32 %v1021_v57, %v870_v34  ;;  %v859_v41 = vpop.xlane.xlu0 %858 }
 0x241   : > { %v871_v21 = vadd.f32 %v859_v41, %v3092_v26 }
 0x242   : > { %1488 = vadd.xlane.f32.xlu1 %v2950_v11  ;;  %v1504_v11 = vmul.f32 %v2964_v58, %v2964_v58 }
 0x243   : > { %1510 = vadd.xlane.f32.xlu0 %v1501_v5  ;;  %v853_v4 = vpop.xlane.xlu1 %852 }
 0x244   : > { %v868_v15 = vadd.f32 %v853_v4, %v3085_v10  ;;  %v987_v40 = vpop.xlane.xlu0 %986 }
 0x245   : > { %v3172_v3 = vadd.f32 %v987_v40, %v837_v39 }
 0x246   : > { %1652 = vadd.xlane.f32.xlu1 %v2952_v49 }
 0x247   : > { %1674 = vadd.xlane.f32.xlu0 %v1665_v36  ;;  %v1017_v60 = vpop.xlane.xlu1 %1016 }
 0x248   : > { %v3177_v26 = vadd.f32 %v1017_v60, %v868_v15  ;;  %v1023_v53 = vpop.xlane.xlu0 %1022 }
 0x249   : > { %v3179_v63 = vadd.f32 %v1023_v53, %v871_v21 }
 0x24a   : > { %1484 = vadd.xlane.f32.xlu1 %v2964_v58 }
 0x24b   : > { %1490 = vadd.xlane.f32.xlu0 %v2974_v59  ;;  %v833_v10 = vpop.xlane.xlu1 %832  ;;  %v1670_v59 = vmul.f32 %v2952_v49, %v2952_v49 }
 0x24c   : > { %v842_v45 = vadd.f32 %v833_v10, %v3099_v31  ;;  %v855_v62 = vpop.xlane.xlu0 %854 }
 0x24d   : > { %v869_v32 = vadd.f32 %v855_v62, %v3101_v33 }
 0x24e   : > { %1520 = vadd.xlane.f32.xlu1 %v1506_v0 }
 0x24f   : > { %1654 = vadd.xlane.f32.xlu0 %v2980_v19  ;;  %v997_v23 = vpop.xlane.xlu1 %996 }
 0x250   : > { %v3188_v54 = vadd.f32 %v997_v23, %v842_v45  ;;  %v1019_v17 = vpop.xlane.xlu0 %1018 }
 0x251   : > { %v3190_v16 = vadd.f32 %v1019_v17, %v869_v32 }
 0x252   : > { %1648 = vadd.xlane.f32.xlu1 %v2966_v1 }
 0x253   : > { %1486 = vadd.xlane.f32.xlu0 %v2989_v20  ;;  %v829_v31 = vpop.xlane.xlu1 %828  ;;  %v1671_v20 = vmul.f32 %v2980_v19, %v2980_v19 }
 0x254   : > { %v840_v24 = vadd.f32 %v829_v31, %v3114_v61  ;;  %v835_v55 = vpop.xlane.xlu0 %834 }
 0x255   : > { %v843_v33 = vadd.f32 %v835_v55, %v3111_v42 }
 0x256   : > { %1516 = vadd.xlane.f32.xlu1 %v1504_v11 }
 0x257   : > { %1522 = vadd.xlane.f32.xlu0 %v1507_v50  ;;  %v865_v29 = vpop.xlane.xlu1 %864 }
 0x258   : > { %v874_v22 = vadd.f32 %v865_v29, %v3120_v44  ;;  %v999_v56 = vpop.xlane.xlu0 %998 }
 0x259   : > { %v3203_v13 = vadd.f32 %v999_v56, %v843_v33 }
 0x25a   : > { %1680 = vadd.xlane.f32.xlu1 %v1668_v25 }
 0x25b   : > { %1650 = vadd.xlane.f32.xlu0 %v2991_v18  ;;  %v993_v58 = vpop.xlane.xlu1 %992 }
 0x25c   : > { %v1004_v61 = vadd.f32 %v993_v58, %v840_v24  ;;  %v831_v42 = vpop.xlane.xlu0 %830 }
 0x25d   : > { %v841_v44 = vadd.f32 %v831_v42, %v3125_v51 }
 0x25e   : > { %1684 = vadd.xlane.f32.xlu1 %v1670_v59 }
 0x25f   : > { %1518 = vadd.xlane.f32.xlu0 %v1505_v7  ;;  %v1029_v27 = vpop.xlane.xlu1 %1028 }
 0x260   : > { %v1038_v1 = vadd.f32 %v1029_v27, %v874_v22  ;;  %v867_v28 = vpop.xlane.xlu0 %866 }
 0x261   : > { %v875_v30 = vadd.f32 %v867_v28, %v3132_v47 }
 0x263   : > { %1682 = vadd.xlane.f32.xlu0 %v1669_v8  ;;  %v861_v34 = vpop.xlane.xlu1 %860 }
 0x264   : > { %v872_v35 = vadd.f32 %v861_v34, %v3130_v12  ;;  %v995_v49 = vpop.xlane.xlu0 %994 }
 0x265   : > { %v1005_v37 = vadd.f32 %v995_v49, %v841_v44 }
 0x267   : > { %1686 = vadd.xlane.f32.xlu0 %v1671_v20  ;;  %v1025_v51 = vpop.xlane.xlu1 %1024 }
 0x268   : > { %v3217_v52 = vadd.f32 %v1025_v51, %v872_v35  ;;  %v1031_v46 = vpop.xlane.xlu0 %1030 }
 0x269   : > { %v1039_v48 = vadd.f32 %v1031_v46, %v875_v30 }
 0x26b   : > { %v1153_v39 = vpop.xlane.xlu1 %1152 }
 0x26c   : > { %v863_v6 = vpop.xlane.xlu0 %862  ;;  %v1166_v27 = vadd.f32 %v1153_v39, %v3140_v9 }
 0x26d   : > { %v873_v18 = vadd.f32 %v863_v6, %v3142_v2 }
 0x26f   : > { %v1317_v47 = vpop.xlane.xlu1 %1316 }
 0x270   : > { %v1027_v57 = vpop.xlane.xlu0 %1026  ;;  %v1330_v28 = vadd.f32 %v1317_v47, %v1166_v27 }
 0x271   : > { %v3220_v41 = vadd.f32 %v1027_v57, %v873_v18 }
 0x273   : > { %v1149_v12 = vpop.xlane.xlu1 %1148 }
 0x274   : > { %v1164_v21 = vadd.f32 %v1149_v12, %v3158_v14  ;;  %v1155_v5 = vpop.xlane.xlu0 %1154 }
 0x275   : > { %v1167_v9 = vadd.f32 %v1155_v5, %v3155_v38 }
 0x277   : > { %v1185_v4 = vpop.xlane.xlu1 %1184 }
 0x278   : > { %v1198_v19 = vadd.f32 %v1185_v4, %v3165_v43  ;;  %v1319_v15 = vpop.xlane.xlu0 %1318 }
 0x279   : > { %v1331_v51 = vadd.f32 %v1319_v15, %v1167_v9 }
 0x27b   : > { %v1313_v40 = vpop.xlane.xlu1 %1312 }
 0x27c   : > { %v1151_v36 = vpop.xlane.xlu0 %1150  ;;  %v1328_v39 = vadd.f32 %v1313_v40, %v1164_v21 }
 0x27d   : > { %v1165_v60 = vadd.f32 %v1151_v36, %v3172_v3 }
 0x27f   : > { %v1349_v53 = vpop.xlane.xlu1 %1348 }
 0x280   : > { %v1187_v10 = vpop.xlane.xlu0 %1186  ;;  %v1362_v12 = vadd.f32 %v1349_v53, %v1198_v19 }
 0x281   : > { %v3226_v2 = vadd.f32 %v1187_v10, %v3179_v63 }
 0x283   : > { %v1181_v45 = vpop.xlane.xlu1 %1180 }
 0x284   : > { %v1315_v62 = vpop.xlane.xlu0 %1314  ;;  %v1196_v21 = vadd.f32 %v1181_v45, %v3177_v26 }
 0x287   : > { %v1345_v0 = vpop.xlane.xlu1 %1344 }
 0x288   : > { %v1351_v32 = vpop.xlane.xlu0 %1350 }
 0x289   : > { %v1363_v53 = vadd.f32 %v1351_v32, %v3226_v2 }
 0x28b   : > { %v3228_v23 = vpop.xlane.xlu1 %1160 }
 0x28c   : > { %v3230_v14 = vpop.xlane.xlu0 %1182  ;;  %v1170_v45 = vadd.f32 %v3228_v23, %v3188_v54 }
 0x28f   : > { %v3232_v17 = vpop.xlane.xlu1 %1324 }
 0x290   : > { %v3234_v43 = vpop.xlane.xlu0 %1346 }
 0x293   : > { %v1157_v31 = vpop.xlane.xlu1 %1156 }
 0x294   : > { %v3236_v24 = vadd.f32 %v1157_v31, %v1004_v61  ;;  %v3238_v3 = vpop.xlane.xlu0 %1162  ;;  %v1329_v31 = vadd.f32 %v1315_v62, %v1165_v60  ;;  %v1197_v62 = vadd.f32 %v3230_v14, %v3190_v16 }
 0x295   : > { %v1171_v16 = vadd.f32 %v3238_v3, %v3203_v13 }
 0x296   : > { %v1361_v27 = vadd.f32 %v3234_v43, %v1197_v62 }
 0x297   : > { %v1193_v55 = vpop.xlane.xlu1 %1192 }
 0x298   : > { %v1202_v63 = vadd.f32 %v1193_v55, %v1038_v1  ;;  %v3240_v11 = vpop.xlane.xlu0 %1326 }
 0x29b   : > { %v3242_v33 = vpop.xlane.xlu1 %1320 }
 0x29c   : > { %v1159_v50 = vpop.xlane.xlu0 %1158 }
 0x29d   : > { %v3244_v29 = vadd.f32 %v1159_v50, %v1005_v37 }
 0x29f   : > { %v1357_v22 = vpop.xlane.xlu1 %1356 }
 0x2a0   : > { %v3246_v56 = vadd.f32 %v1357_v22, %v1202_v63  ;;  %v1195_v25 = vpop.xlane.xlu0 %1194  ;;  %v1360_v63 = vadd.f32 %v1345_v0, %v1196_v21  ;;  %v1334_v0 = vadd.f32 %v3232_v17, %v1170_v45 }
 0x2a1   : > { %v1203_v58 = vadd.f32 %v1195_v25, %v1039_v48 }
 0x2a3   : > { %v3248_v42 = vpop.xlane.xlu1 %1188 }
 0x2a4   : > { %v3250_v61 = vpop.xlane.xlu0 %1322 }
 0x2a7   : > { %v3252_v59 = vpop.xlane.xlu1 %1352 }
 0x2a8   : > { %v1359_v7 = vpop.xlane.xlu0 %1358 }
 0x2a9   : > { %v3254_v44 = vadd.f32 %v1359_v7, %v1203_v58 }
 0x2ab   : > { %v1481_v1 = vpop.xlane.xlu1 %1480 }
 0x2ac   : > { %v3257_v8 = vpop.xlane.xlu0 %1190  ;;  %v1494_v30 = vadd.f32 %v1481_v1, %v1330_v28 }
 0x2af   : > { %v1645_v34 = vpop.xlane.xlu1 %1644 }
 0x2b0   : > { %v1658_v35 = vadd.f32 %v1645_v34, %v1494_v30  ;;  %v3265_v49 = vpop.xlane.xlu0 %1354 }
 0x2b2   : > { %1732 = vst.msk [vmem:[%s3263_s24 + $0x10] sm:$0xff] %vm1729_vm3, %v1658_v35  ;;  %v1335_v35 = vadd.f32 %v3240_v11, %v1171_v16 }
 0x2b3   : > { %v1477_v37 = vpop.xlane.xlu1 %1476 }
 0x2b4   : > { %v1483_v20 = vpop.xlane.xlu0 %1482  ;;  %v1492_v47 = vadd.f32 %v1477_v37, %v1328_v39  ;;  %v1332_v37 = vadd.f32 %v3242_v33, %v3236_v24  ;;  %v1200_v39 = vadd.f32 %v3248_v42, %v3217_v52  ;;  %v1333_v24 = vadd.f32 %v3250_v61, %v3244_v29 }
 0x2b5   : > { %v1495_v46 = vadd.f32 %v1483_v20, %v1331_v51  ;;  %v1201_v52 = vadd.f32 %v3257_v8, %v3220_v41 }
 0x2b7   : > { %v1513_v48 = vpop.xlane.xlu1 %1512  ;;  %v1365_v61 = vadd.f32 %v3265_v49, %v1201_v52 }
 0x2b8   : > { %v1647_v6 = vpop.xlane.xlu0 %1646  ;;  %v1526_v10 = vadd.f32 %v1513_v48, %v1362_v12 }
 0x2b9   : > { %v1659_v18 = vadd.f32 %v1647_v6, %v1495_v46  ;;  %v1364_v6 = vadd.f32 %v3252_v59, %v1200_v39 }
 0x2bb   : > { %1733 = vst.msk [vmem:[%s3263_s24 + $0x18] sm:$0xff] %vm1729_vm3, %v1659_v18  ;;  %v1641_v57 = vpop.xlane.xlu1 %1640 }
 0x2bc   : > { %v1656_v4 = vadd.f32 %v1641_v57, %v1492_v47  ;;  %v1479_v36 = vpop.xlane.xlu0 %1478 }
 0x2bd   : > { %v1493_v40 = vadd.f32 %v1479_v36, %v1329_v31 }
 0x2be   : > { %1730 = vst.msk [vmem:[%s3263_s24] sm:$0xff] %vm1729_vm3, %v1656_v4 }
 0x2bf   : > { %v1677_v38 = vpop.xlane.xlu1 %1676 }
 0x2c0   : > { %v1690_v5 = vadd.f32 %v1677_v38, %v1526_v10  ;;  %v1515_v15 = vpop.xlane.xlu0 %1514 }
 0x2c1   : > { %v1527_v25 = vadd.f32 %v1515_v15, %v1363_v53 }
 0x2c2   : > { %2044 = vst.msk [vmem:[%s3263_s24 + $0x50] sm:$0xff] %vm1729_vm3, %v1690_v5 }
 0x2c3   : > { %v1509_v55 = vpop.xlane.xlu1 %1508 }
 0x2c4   : > { %v1643_v19 = vpop.xlane.xlu0 %1642  ;;  %v1524_v22 = vadd.f32 %v1509_v55, %v1360_v63 }
 0x2c5   : > { %v1657_v50 = vadd.f32 %v1643_v19, %v1493_v40 }
 0x2c7   : > { %1731 = vst.msk [vmem:[%s3263_s24 + $0x8] sm:$0xff] %vm1729_vm3, %v1657_v50  ;;  %v1673_v58 = vpop.xlane.xlu1 %1672 }
 0x2c8   : > { %v1688_v7 = vadd.f32 %v1673_v58, %v1524_v22  ;;  %v1679_v60 = vpop.xlane.xlu0 %1678 }
 0x2c9   : > { %v1691_v26 = vadd.f32 %v1679_v60, %v1527_v25 }
 0x2ca   : > { %2042 = vst.msk [vmem:[%s3263_s24 + $0x40] sm:$0xff] %vm1729_vm3, %v1688_v7 }
 0x2cb   : > { %2045 = vst.msk [vmem:[%s3263_s24 + $0x58] sm:$0xff] %vm1729_vm3, %v1691_v26  ;;  %v1489_v2 = vpop.xlane.xlu1 %1488 }
 0x2cc   : > { %v1511_v32 = vpop.xlane.xlu0 %1510  ;;  %v1498_v1 = vadd.f32 %v1489_v2, %v1334_v0 }
 0x2cd   : > { %v1525_v28 = vadd.f32 %v1511_v32, %v1361_v27 }
 0x2cf   : > { %v1653_v30 = vpop.xlane.xlu1 %1652 }
 0x2d0   : > { %v1662_v34 = vadd.f32 %v1653_v30, %v1498_v1  ;;  %v1675_v54 = vpop.xlane.xlu0 %1674 }
 0x2d1   : > { %v1689_v23 = vadd.f32 %v1675_v54, %v1525_v28 }
 0x2d2   : > { %1736 = vst.msk [vmem:[%s3263_s24 + $0x30] sm:$0xff] %vm1729_vm3, %v1662_v34 }
 0x2d3   : > { %2043 = vst.msk [vmem:[%s3263_s24 + $0x48] sm:$0xff] %vm1729_vm3, %v1689_v23  ;;  %v1485_v14 = vpop.xlane.xlu1 %1484 }
 0x2d4   : > { %v1491_v17 = vpop.xlane.xlu0 %1490  ;;  %v1496_v46 = vadd.f32 %v1485_v14, %v1332_v37 }
 0x2d5   : > { %v1499_v43 = vadd.f32 %v1491_v17, %v1335_v35 }
 0x2d7   : > { %v1521_v9 = vpop.xlane.xlu1 %1520 }
 0x2d8   : > { %v1655_v20 = vpop.xlane.xlu0 %1654  ;;  %v1530_v10 = vadd.f32 %v1521_v9, %v3246_v56 }
 0x2d9   : > { %v1663_v51 = vadd.f32 %v1655_v20, %v1499_v43 }
 0x2db   : > { %1737 = vst.msk [vmem:[%s3263_s24 + $0x38] sm:$0xff] %vm1729_vm3, %v1663_v51  ;;  %v1649_v48 = vpop.xlane.xlu1 %1648 }
 0x2dc   : > { %v1660_v13 = vadd.f32 %v1649_v48, %v1496_v46  ;;  %v1487_v3 = vpop.xlane.xlu0 %1486 }
 0x2dd   : > { %v1497_v47 = vadd.f32 %v1487_v3, %v1333_v24 }
 0x2de   : > { %1734 = vst.msk [vmem:[%s3263_s24 + $0x20] sm:$0xff] %vm1729_vm3, %v1660_v13 }
 0x2df   : > { %v1517_v11 = vpop.xlane.xlu1 %1516 }
 0x2e0   : > { %v1523_v18 = vpop.xlane.xlu0 %1522  ;;  %v1528_v33 = vadd.f32 %v1517_v11, %v1364_v6 }
 0x2e1   : > { %v1531_v56 = vadd.f32 %v1523_v18, %v3254_v44 }
 0x2e3   : > { %v1681_v57 = vpop.xlane.xlu1 %1680 }
 0x2e4   : > { %v1692_v12 = vadd.f32 %v1681_v57, %v1528_v33  ;;  %v1651_v4 = vpop.xlane.xlu0 %1650 }
 0x2e5   : > { %v1661_v36 = vadd.f32 %v1651_v4, %v1497_v47 }
 0x2e6   : > { %2046 = vst.msk [vmem:[%s3263_s24 + $0x60] sm:$0xff] %vm1729_vm3, %v1692_v12 }
 0x2e7   : > { %1735 = vst.msk [vmem:[%s3263_s24 + $0x28] sm:$0xff] %vm1729_vm3, %v1661_v36  ;;  %v1685_v42 = vpop.xlane.xlu1 %1684 }
 0x2e8   : > { %v1694_v59 = vadd.f32 %v1685_v42, %v1530_v10  ;;  %v1519_v29 = vpop.xlane.xlu0 %1518 }
 0x2e9   : > { %v1529_v38 = vadd.f32 %v1519_v29, %v1365_v61 }
 0x2ea   : > { %2048 = vst.msk [vmem:[%s3263_s24 + $0x70] sm:$0xff] %vm1729_vm3, %v1694_v59 }
 0x2ec   : > { %v1683_v5 = vpop.xlane.xlu0 %1682 }
 0x2ed   : > { %v1693_v15 = vadd.f32 %v1683_v5, %v1529_v38 }
 0x2ef   : > { %2047 = vst.msk [vmem:[%s3263_s24 + $0x68] sm:$0xff] %vm1729_vm3, %v1693_v15 }
 0x2f0   : > { %v1687_v31 = vpop.xlane.xlu0 %1686 }
 0x2f1   : > { %v1695_v21 = vadd.f32 %v1687_v31, %v1531_v56 }
 0x2f3   : > { %2049 = vst.msk [vmem:[%s3263_s24 + $0x78] sm:$0xff] %vm1729_vm3, %v1695_v21 }
 0x2f4 PF: > { %s16_s20 = sadd.s32 1, %s2333_s20   ;;  %s3352_s18 = smov %s2329_s19 }
 0x2f5   : > { %p13_p5 = scmp.ge.s32.totalorder %s16_s20, 4   ;;  %s3353_s19 = smov %s3355_s21 }
 0x2f7   :  { %15 = sbr.rel (!%p13_p5) target bundleno = 2 (0x2), region = 93 }

</bundles_post_ra>
